<compile_context>
chip_gen: v6e
topology: v6e:2x2x1
jax: 0.10.0
libtpu: 0.0.40
codegen_flags: <defaults>
</compile_context>

<pallas_src>
import functools
import math

import jax
import jax.numpy as jnp
from jax.experimental import pallas as pl
from jax.experimental.pallas import tpu as pltpu

# ----------------------------- configuration -------------------------------
BATCH = 2
IMG = 16            # img_size
CIN = 4             # n_input_channels
EMBED = 32          # embedding_dim
N_CONV = 2          # n_conv_layers
KSIZE, STRIDE, PAD = 3, 1, 1
POOL_K, POOL_S, POOL_P = 3, 2, 1
IN_PLANES = 16      # tokenizer hidden channels (small synthetic config)
N_LAYERS = 2
HEADS = 4
MLP_RATIO = 2.0
NUM_CLASSES = 10


def _conv_out(h, k, s, p):
    return (h + 2 * p - k) // s + 1


_h = IMG
for _ in range(N_CONV):
    _h = _conv_out(_h, KSIZE, STRIDE, PAD)
    _h = _conv_out(_h, POOL_K, POOL_S, POOL_P)
SEQ_LEN = _h * _h   # tokenizer.sequence_length()

_PARALLEL = pltpu.CompilerParams(dimension_semantics=("parallel",))


# --------------------- tokenizer: fused conv+ReLU+pool ----------------------
def _conv_relu_pool_kernel(cols_ref, w_ref, add_ref, o_ref, *, n_win):
    """cols:(1, n_win*P, K)  w:(K, C)  add:(1, P, C)  out:(1, P, C)."""
    y = jnp.dot(cols_ref[0], w_ref[...], preferred_element_type=jnp.float32)
    y = jnp.maximum(y, 0.0)                      # ReLU -> all values >= 0
    P = y.shape[0] // n_win
    m = y[0:P]
    for d in range(1, n_win):                    # max-pool over shifted windows
        m = jnp.maximum(m, y[d * P:(d + 1) * P])
    o_ref[...] = (m + add_ref[0])[None, :, :].astype(o_ref.dtype)


def conv_relu_pool(cols, wf, extra):
    """Fused im2col-GEMM + ReLU + MaxPool (+ optional broadcast add)."""
    B, M, K = cols.shape
    _, C = wf.shape
    P = extra.shape[1]
    n_win = M // P
    return pl.pallas_call(
        functools.partial(_conv_relu_pool_kernel, n_win=n_win),
        out_shape=jax.ShapeDtypeStruct((B, P, C), jnp.float32),
        grid=(B,),
        in_specs=[pl.BlockSpec((1, M, K), lambda b: (b, 0, 0)),
                  pl.BlockSpec((K, C), lambda b: (0, 0)),
                  pl.BlockSpec((1, P, C), lambda b: (0, 0, 0))],
        out_specs=pl.BlockSpec((1, P, C), lambda b: (b, 0, 0)),
        compiler_params=_PARALLEL,
    )(cols.astype(jnp.float32), wf.astype(jnp.float32),
      extra.astype(jnp.float32))


def pool_shifted_im2col(x_nhwc, k, stride, pad, pk, ps, pp):
    """Build im2col rows for every conv-output position needed by each of the
    pk*pk max-pool window offsets.  Out-of-range pool positions get all-zero
    rows; after ReLU this is equivalent to PyTorch's -inf pool padding because
    every window contains at least one valid (>=0) element."""
    B, H, W, C = x_nhwc.shape
    Ho = _conv_out(H, k, stride, pad)
    Wo = _conv_out(W, k, stride, pad)
    xp = jnp.pad(x_nhwc, ((0, 0), (pad, pad), (pad, pad), (0, 0)))
    patches = [xp[:, i:i + stride * (Ho - 1) + 1:stride,
                  j:j + stride * (Wo - 1) + 1:stride, :]
               for i in range(k) for j in range(k)]
    cols = jnp.concatenate(patches, axis=-1)               # (B, Ho, Wo, k*k*C)
    colsp = jnp.pad(cols, ((0, 0), (pp, pp), (pp, pp), (0, 0)))
    Hp = _conv_out(Ho, pk, ps, pp)
    Wp = _conv_out(Wo, pk, ps, pp)
    shifted = [colsp[:, dh:dh + ps * (Hp - 1) + 1:ps,
                     dw:dw + ps * (Wp - 1) + 1:ps, :]
               for dh in range(pk) for dw in range(pk)]
    out = jnp.stack(shifted, axis=1)                       # (B, pk*pk, Hp, Wp, K)
    return out.reshape(B, pk * pk * Hp * Wp, k * k * C), Hp, Wp


def tokenizer_forward(x, conv_weights, pos_emb):
    """Conv(no bias) -> ReLU -> MaxPool, repeated; returns (B, seq, embed)
    tokens with the positional embedding already added (fused into the last
    conv layer's kernel)."""
    x = x.transpose(0, 2, 3, 1)                            # NHWC
    n_layers = len(conv_weights)
    y = None
    for li, w in enumerate(conv_weights):
        cout = w.shape[0]
        cols, Hp, Wp = pool_shifted_im2col(x, KSIZE, STRIDE, PAD,
                                           POOL_K, POOL_S, POOL_P)
        # column order is (kh, kw, Cin) -> reorder the (Cout,Cin,kh,kw) weight
        wf = w.transpose(2, 3, 1, 0).reshape(-1, cout)
        extra = (pos_emb if li == n_layers - 1
                 else jnp.zeros((1, Hp * Wp, cout), jnp.float32))
        y = conv_relu_pool(cols, wf, extra)                # (B, Hp*Wp, Cout)
        x = y.reshape(y.shape[0], Hp, Wp, cout)            # NHWC for next layer
    return y                                               # (B, SEQ_LEN, EMBED)


# ------------------ transformer: fused encoder layer kernel -----------------
def _encoder_layer_kernel(x_ref, lnp_g_ref, lnp_b_ref, w_qkv_ref, w_proj_ref,
                          b_proj_ref, ln1_g_ref, ln1_b_ref, w_fc1_ref,
                          b_fc1_ref, w_fc2_ref, b_fc2_ref, o_ref,
                          *, heads, scale):
    x = x_ref[0]                                           # (S, D)
    S, D = x.shape
    Dh = D // heads

    def layernorm(v, g, b):
        mu = jnp.mean(v, axis=-1, keepdims=True)
        vc = v - mu
        var = jnp.mean(vc * vc, axis=-1, keepdims=True)
        return vc * jax.lax.rsqrt(var + 1e-5) * g + b

    # --- self attention on pre-normed input, residual add ---
    h = layernorm(x, lnp_g_ref[...], lnp_b_ref[...])
    qkv = jnp.dot(h, w_qkv_ref[...], preferred_element_type=jnp.float32)  # (S, 3D)
    w_proj = w_proj_ref[...]
    attn = jnp.zeros((S, D), jnp.float32)
    for hd in range(heads):                                # heads unrolled in-kernel
        q = qkv[:, hd * Dh:(hd + 1) * Dh]
        k = qkv[:, D + hd * Dh:D + (hd + 1) * Dh]
        v = qkv[:, 2 * D + hd * Dh:2 * D + (hd + 1) * Dh]
        s = jax.lax.dot_general(q, k, (((1,), (1,)), ((), ())),
                                preferred_element_type=jnp.float32) * scale
        s = s - jnp.max(s, axis=-1, keepdims=True)
        e = jnp.exp(s)
        p = e * pl.reciprocal(jnp.sum(e, axis=-1, keepdims=True), approx=True)
        o_h = jnp.dot(p, v, preferred_element_type=jnp.float32)           # (S, Dh)
        # concat-over-heads followed by @W_proj == sum_h o_h @ W_proj[hDh:(h+1)Dh]
        attn = attn + jnp.dot(o_h, w_proj[hd * Dh:(hd + 1) * Dh, :],
                              preferred_element_type=jnp.float32)
    x = x + attn + b_proj_ref[...]
    # --- norm1 then MLP residual on the normed value (matches CCT layer) ---
    xn = layernorm(x, ln1_g_ref[...], ln1_b_ref[...])
    hm = jnp.dot(xn, w_fc1_ref[...], preferred_element_type=jnp.float32) + b_fc1_ref[...]
    hm = 0.5 * hm * (1.0 + jax.lax.erf(hm * (1.0 / math.sqrt(2.0))))      # exact GELU
    hm = jnp.dot(hm, w_fc2_ref[...], preferred_element_type=jnp.float32) + b_fc2_ref[...]
    o_ref[...] = (xn + hm)[None, :, :].astype(o_ref.dtype)


def encoder_layer(x, blk):
    B, S, D = x.shape
    dff = blk["w_fc1"].shape[1]
    row = lambda v: v.reshape(1, -1).astype(jnp.float32)
    vec = lambda n: pl.BlockSpec((1, n), lambda b: (0, 0))
    mat = lambda m, n: pl.BlockSpec((m, n), lambda b: (0, 0))
    return pl.pallas_call(
        functools.partial(_encoder_layer_kernel, heads=HEADS,
                          scale=1.0 / math.sqrt(D // HEADS)),
        out_shape=jax.ShapeDtypeStruct((B, S, D), jnp.float32),
        grid=(B,),
        in_specs=[pl.BlockSpec((1, S, D), lambda b: (b, 0, 0)),
                  vec(D), vec(D),
                  mat(D, 3 * D),
                  mat(D, D), vec(D),
                  vec(D), vec(D),
                  mat(D, dff), vec(dff),
                  mat(dff, D), vec(D)],
        out_specs=pl.BlockSpec((1, S, D), lambda b: (b, 0, 0)),
        compiler_params=_PARALLEL,
    )(x.astype(jnp.float32),
      row(blk["ln_pre_g"]), row(blk["ln_pre_b"]),
      blk["w_qkv"].astype(jnp.float32),
      blk["w_proj"].astype(jnp.float32), row(blk["b_proj"]),
      row(blk["ln1_g"]), row(blk["ln1_b"]),
      blk["w_fc1"].astype(jnp.float32), row(blk["b_fc1"]),
      blk["w_fc2"].astype(jnp.float32), row(blk["b_fc2"]))


# ------------------- classifier head: LN + seq-pool + FC --------------------
def _head_kernel(x_ref, g_ref, b_ref, pw_ref, pb_ref, fw_ref, fb_ref, o_ref):
    x = x_ref[0]                                           # (S, D)
    mu = jnp.mean(x, axis=-1, keepdims=True)
    xc = x - mu
    var = jnp.mean(xc * xc, axis=-1, keepdims=True)
    xn = xc * jax.lax.rsqrt(var + 1e-5) * g_ref[...] + b_ref[...]
    logits = jnp.dot(xn, pw_ref[...], preferred_element_type=jnp.float32) + pb_ref[...]
    logits = logits - jnp.max(logits, axis=0, keepdims=True)
    e = jnp.exp(logits)
    w = e * pl.reciprocal(jnp.sum(e, axis=0, keepdims=True), approx=True)  # softmax over seq
    pooled = jnp.sum(xn * w, axis=0, keepdims=True)                        # (1, D)
    out = jnp.dot(pooled, fw_ref[...], preferred_element_type=jnp.float32) + fb_ref[...]
    o_ref[...] = out[None, :, :].astype(o_ref.dtype)


def classifier_head(x, p):
    B, S, D = x.shape
    NC = p["fc_w"].shape[1]
    out = pl.pallas_call(
        _head_kernel,
        out_shape=jax.ShapeDtypeStruct((B, 1, NC), jnp.float32),
        grid=(B,),
        in_specs=[pl.BlockSpec((1, S, D), lambda b: (b, 0, 0)),
                  pl.BlockSpec((1, D), lambda b: (0, 0)),
                  pl.BlockSpec((1, D), lambda b: (0, 0)),
                  pl.BlockSpec((D, 1), lambda b: (0, 0)),
                  pl.BlockSpec((1, 1), lambda b: (0, 0)),
                  pl.BlockSpec((D, NC), lambda b: (0, 0)),
                  pl.BlockSpec((1, NC), lambda b: (0, 0))],
        out_specs=pl.BlockSpec((1, 1, NC), lambda b: (b, 0, 0)),
        compiler_params=_PARALLEL,
    )(x.astype(jnp.float32),
      p["norm_g"].reshape(1, D).astype(jnp.float32),
      p["norm_b"].reshape(1, D).astype(jnp.float32),
      p["pool_w"].astype(jnp.float32),
      p["pool_b"].reshape(1, 1).astype(jnp.float32),
      p["fc_w"].astype(jnp.float32),
      p["fc_b"].reshape(1, NC).astype(jnp.float32))
    return out.reshape(B, NC)


# ------------------------------- forward ------------------------------------
def classifier_forward(tokens, p):
    # TODO(synk): nn.Dropout / attention dropout / DropPath (stochastic depth)
    # are train-only; eval identity here.  pos_emb already added in tokenizer.
    x = tokens
    for blk in p["blocks"]:
        x = encoder_layer(x, blk)
    return classifier_head(x, p)


def cct_forward(x, params):
    tokens = tokenizer_forward(x, params["conv_w"], params["pos_emb"])
    return classifier_forward(tokens, params)


# ------------------------------- parameters --------------------------------
def init_params(key):
    keys = iter(jax.random.split(key, 128))

    def nrm(shape, std=0.02):
        return jax.random.normal(next(keys), shape, jnp.float32) * std

    chans = [CIN] + [IN_PLANES] * (N_CONV - 1) + [EMBED]
    params = {
        "conv_w": [nrm((chans[l + 1], chans[l], KSIZE, KSIZE), std=0.1)
                   for l in range(N_CONV)],
        "pos_emb": nrm((1, SEQ_LEN, EMBED), std=0.2),
        "norm_g": jnp.ones((EMBED,), jnp.float32),
        "norm_b": jnp.zeros((EMBED,), jnp.float32),
        "pool_w": nrm((EMBED, 1)),
        "pool_b": jnp.zeros((1,), jnp.float32),
        "fc_w": nrm((EMBED, NUM_CLASSES)),
        "fc_b": jnp.zeros((NUM_CLASSES,), jnp.float32),
    }
    dff = int(EMBED * MLP_RATIO)
    blocks = []
    for _ in range(N_LAYERS):
        blocks.append(dict(
            ln_pre_g=jnp.ones((EMBED,), jnp.float32),
            ln_pre_b=jnp.zeros((EMBED,), jnp.float32),
            w_qkv=nrm((EMBED, 3 * EMBED)),
            w_proj=nrm((EMBED, EMBED)),
            b_proj=jnp.zeros((EMBED,), jnp.float32),
            ln1_g=jnp.ones((EMBED,), jnp.float32),
            ln1_b=jnp.zeros((EMBED,), jnp.float32),
            w_fc1=nrm((EMBED, dff)),
            b_fc1=jnp.zeros((dff,), jnp.float32),
            w_fc2=nrm((dff, EMBED)),
            b_fc2=jnp.zeros((EMBED,), jnp.float32),
        ))
    params["blocks"] = blocks
    return params


# ---------------------------------- main ------------------------------------
if __name__ == "__main__":
    key = jax.random.PRNGKey(0)
    kx, kp = jax.random.split(key)
    x = jax.random.normal(kx, (BATCH, CIN, IMG, IMG), jnp.float32)
    params = init_params(kp)

    out = jax.jit(cct_forward)(x, params)
    out = jax.block_until_ready(out)
    assert out.shape == (BATCH, NUM_CLASSES), out.shape
    assert bool(jnp.all(jnp.isfinite(out)))
    print("KERNEL_OK")
</pallas_src>

<mosaic_0001>
module attributes {stable_mosaic.version = 11 : i64} {
  func.func @_conv_relu_pool_kernel(%arg0: i32, %arg1: memref<1x576x36xf32, #tpu.memory_space<vmem>>, %arg2: memref<36x16xf32, #tpu.memory_space<vmem>>, %arg3: memref<1x64x16xf32, #tpu.memory_space<vmem>>, %arg4: memref<1x64x16xf32, #tpu.memory_space<vmem>>) attributes {dimension_semantics = [#tpu.dimension_semantics<parallel>], iteration_bounds = array<i64: 2>, scalar_prefetch = 0 : i64, scratch_operands = 0 : i64, tpu.core_type = #tpu.core_type<tc>, window_params = [{transform_indices = @transform_0, window_bounds = array<i64: 1, 576, 36>}, {pipeline_mode = #tpu.pipeline_mode<synchronous>, transform_indices = @transform_1, window_bounds = array<i64: 36, 16>}, {pipeline_mode = #tpu.pipeline_mode<synchronous>, transform_indices = @transform_2, window_bounds = array<i64: 1, 64, 16>}, {transform_indices = @transform_3, window_bounds = array<i64: 1, 64, 16>}]} {
    %c0 = arith.constant 0 : index
    %c0_0 = arith.constant 0 : index
    %c0_1 = arith.constant 0 : index
    %0 = vector.load %arg1[%c0, %c0_0, %c0_1] : memref<1x576x36xf32, #tpu.memory_space<vmem>>, vector<1x576x36xf32>
    %1 = vector.shape_cast %0 : vector<1x576x36xf32> to vector<576x36xf32>
    %c0_2 = arith.constant 0 : index
    %c0_3 = arith.constant 0 : index
    %2 = vector.load %arg2[%c0_2, %c0_3] : memref<36x16xf32, #tpu.memory_space<vmem>>, vector<36x16xf32>
    %cst = arith.constant dense<0.000000e+00> : vector<576x16xf32>
    %3 = tpu.matmul %1, %2, %cst {dimension_numbers = #tpu.dot_dimension_numbers<[1], [0], [0], [1], [0, 0, 1, 1], [], []>} : vector<576x36xf32>, vector<36x16xf32>, vector<576x16xf32> -> vector<576x16xf32>
    %cst_4 = arith.constant 0.000000e+00 : f32
    %4 = vector.broadcast %cst_4 : f32 to vector<576x16xf32>
    %5 = arith.maximumf %3, %4 : vector<576x16xf32>
    %6 = vector.extract_strided_slice %5 {offsets = [0, 0], sizes = [64, 16], strides = [1, 1]} : vector<576x16xf32> to vector<64x16xf32>
    %7 = vector.extract_strided_slice %5 {offsets = [64, 0], sizes = [64, 16], strides = [1, 1]} : vector<576x16xf32> to vector<64x16xf32>
    %8 = arith.maximumf %6, %7 : vector<64x16xf32>
    %9 = vector.extract_strided_slice %5 {offsets = [128, 0], sizes = [64, 16], strides = [1, 1]} : vector<576x16xf32> to vector<64x16xf32>
    %10 = arith.maximumf %8, %9 : vector<64x16xf32>
    %11 = vector.extract_strided_slice %5 {offsets = [192, 0], sizes = [64, 16], strides = [1, 1]} : vector<576x16xf32> to vector<64x16xf32>
    %12 = arith.maximumf %10, %11 : vector<64x16xf32>
    %13 = vector.extract_strided_slice %5 {offsets = [256, 0], sizes = [64, 16], strides = [1, 1]} : vector<576x16xf32> to vector<64x16xf32>
    %14 = arith.maximumf %12, %13 : vector<64x16xf32>
    %15 = vector.extract_strided_slice %5 {offsets = [320, 0], sizes = [64, 16], strides = [1, 1]} : vector<576x16xf32> to vector<64x16xf32>
    %16 = arith.maximumf %14, %15 : vector<64x16xf32>
    %17 = vector.extract_strided_slice %5 {offsets = [384, 0], sizes = [64, 16], strides = [1, 1]} : vector<576x16xf32> to vector<64x16xf32>
    %18 = arith.maximumf %16, %17 : vector<64x16xf32>
    %19 = vector.extract_strided_slice %5 {offsets = [448, 0], sizes = [64, 16], strides = [1, 1]} : vector<576x16xf32> to vector<64x16xf32>
    %20 = arith.maximumf %18, %19 : vector<64x16xf32>
    %21 = vector.extract_strided_slice %5 {offsets = [512, 0], sizes = [64, 16], strides = [1, 1]} : vector<576x16xf32> to vector<64x16xf32>
    %22 = arith.maximumf %20, %21 : vector<64x16xf32>
    %c0_5 = arith.constant 0 : index
    %c0_6 = arith.constant 0 : index
    %c0_7 = arith.constant 0 : index
    %23 = vector.load %arg3[%c0_5, %c0_6, %c0_7] : memref<1x64x16xf32, #tpu.memory_space<vmem>>, vector<1x64x16xf32>
    %24 = vector.shape_cast %23 : vector<1x64x16xf32> to vector<64x16xf32>
    %25 = arith.addf %22, %24 : vector<64x16xf32>
    %26 = vector.shape_cast %25 : vector<64x16xf32> to vector<1x64x16xf32>
    %c0_8 = arith.constant 0 : index
    %c0_9 = arith.constant 0 : index
    %c0_10 = arith.constant 0 : index
    %27 = vector.load %arg4[%c0_8, %c0_9, %c0_10] : memref<1x64x16xf32, #tpu.memory_space<vmem>>, vector<1x64x16xf32>
    tpu.vector_store %arg4[%c0_8, %c0_9, %c0_10], %26 {strides = array<i32>} : memref<1x64x16xf32, #tpu.memory_space<vmem>>, vector<1x64x16xf32>,
    return
  }
  func.func @transform_0(%arg0: i32) -> (i32, i32, i32) {
    %c0_i32 = arith.constant 0 : i32
    %c0_i32_0 = arith.constant 0 : i32
    %c0_i32_1 = arith.constant 0 : i32
    return %arg0, %c0_i32, %c0_i32_0 : i32, i32, i32
  }
  func.func @transform_1(%arg0: i32) -> (i32, i32) {
    %c0_i32 = arith.constant 0 : i32
    %c0_i32_0 = arith.constant 0 : i32
    %c0_i32_1 = arith.constant 0 : i32
    return %c0_i32, %c0_i32_0 : i32, i32
  }
  func.func @transform_2(%arg0: i32) -> (i32, i32, i32) {
    %c0_i32 = arith.constant 0 : i32
    %c0_i32_0 = arith.constant 0 : i32
    %c0_i32_1 = arith.constant 0 : i32
    %c0_i32_2 = arith.constant 0 : i32
    return %c0_i32, %c0_i32_0, %c0_i32_1 : i32, i32, i32
  }
  func.func @transform_3(%arg0: i32) -> (i32, i32, i32) {
    %c0_i32 = arith.constant 0 : i32
    %c0_i32_0 = arith.constant 0 : i32
    %c0_i32_1 = arith.constant 0 : i32
    return %arg0, %c0_i32, %c0_i32_0 : i32, i32, i32
  }
}

module attributes {stable_mosaic.version = 11 : i64} {
  func.func @_encoder_layer_kernel(%arg0: i32, %arg1: memref<1x16x32xf32, #tpu.memory_space<vmem>>, %arg2: memref<1x32xf32, #tpu.memory_space<vmem>>, %arg3: memref<1x32xf32, #tpu.memory_space<vmem>>, %arg4: memref<32x96xf32, #tpu.memory_space<vmem>>, %arg5: memref<32x32xf32, #tpu.memory_space<vmem>>, %arg6: memref<1x32xf32, #tpu.memory_space<vmem>>, %arg7: memref<1x32xf32, #tpu.memory_space<vmem>>, %arg8: memref<1x32xf32, #tpu.memory_space<vmem>>, %arg9: memref<32x64xf32, #tpu.memory_space<vmem>>, %arg10: memref<1x64xf32, #tpu.memory_space<vmem>>, %arg11: memref<64x32xf32, #tpu.memory_space<vmem>>, %arg12: memref<1x32xf32, #tpu.memory_space<vmem>>, %arg13: memref<1x16x32xf32, #tpu.memory_space<vmem>>) attributes {dimension_semantics = [#tpu.dimension_semantics<parallel>], iteration_bounds = array<i64: 2>, scalar_prefetch = 0 : i64, scratch_operands = 0 : i64, tpu.core_type = #tpu.core_type<tc>, window_params = [{transform_indices = @transform_0, window_bounds = array<i64: 1, 16, 32>}, {pipeline_mode = #tpu.pipeline_mode<synchronous>, transform_indices = @transform_1, window_bounds = array<i64: 1, 32>}, {pipeline_mode = #tpu.pipeline_mode<synchronous>, transform_indices = @transform_2, window_bounds = array<i64: 1, 32>}, {pipeline_mode = #tpu.pipeline_mode<synchronous>, transform_indices = @transform_3, window_bounds = array<i64: 32, 96>}, {pipeline_mode = #tpu.pipeline_mode<synchronous>, transform_indices = @transform_4, window_bounds = array<i64: 32, 32>}, {pipeline_mode = #tpu.pipeline_mode<synchronous>, transform_indices = @transform_5, window_bounds = array<i64: 1, 32>}, {pipeline_mode = #tpu.pipeline_mode<synchronous>, transform_indices = @transform_6, window_bounds = array<i64: 1, 32>}, {pipeline_mode = #tpu.pipeline_mode<synchronous>, transform_indices = @transform_7, window_bounds = array<i64: 1, 32>}, {pipeline_mode = #tpu.pipeline_mode<synchronous>, transform_indices = @transform_8, window_bounds = array<i64: 32, 64>}, {pipeline_mode = #tpu.pipeline_mode<synchronous>, transform_indices = @transform_9, window_bounds = array<i64: 1, 64>}, {pipeline_mode = #tpu.pipeline_mode<synchronous>, transform_indices = @transform_10, window_bounds = array<i64: 64, 32>}, {pipeline_mode = #tpu.pipeline_mode<synchronous>, transform_indices = @transform_11, window_bounds = array<i64: 1, 32>}, {transform_indices = @transform_12, window_bounds = array<i64: 1, 16, 32>}]} {
    %c0 = arith.constant 0 : index
    %c0_0 = arith.constant 0 : index
    %c0_1 = arith.constant 0 : index
    %0 = vector.load %arg1[%c0, %c0_0, %c0_1] : memref<1x16x32xf32, #tpu.memory_space<vmem>>, vector<1x16x32xf32>
    %1 = vector.shape_cast %0 : vector<1x16x32xf32> to vector<16x32xf32>
    %c0_2 = arith.constant 0 : index
    %c0_3 = arith.constant 0 : index
    %2 = vector.load %arg2[%c0_2, %c0_3] : memref<1x32xf32, #tpu.memory_space<vmem>>, vector<1x32xf32>
    %c0_4 = arith.constant 0 : index
    %c0_5 = arith.constant 0 : index
    %3 = vector.load %arg3[%c0_4, %c0_5] : memref<1x32xf32, #tpu.memory_space<vmem>>, vector<1x32xf32>
    %cst = arith.constant dense<0.000000e+00> : vector<16xf32>
    %4 = vector.multi_reduction <add>, %1, %cst [1] : vector<16x32xf32> to vector<16xf32>
    %5 = vector.shape_cast %4 : vector<16xf32> to vector<16x1xf32>
    %cst_6 = arith.constant 3.200000e+01 : f32
    %6 = vector.broadcast %cst_6 : f32 to vector<16x1xf32>
    %7 = arith.divf %5, %6 : vector<16x1xf32>
    %8 = vector.broadcast %7 : vector<16x1xf32> to vector<16x32xf32>
    %9 = arith.subf %1, %8 : vector<16x32xf32>
    %10 = arith.mulf %9, %9 : vector<16x32xf32>
    %cst_7 = arith.constant dense<0.000000e+00> : vector<16xf32>
    %11 = vector.multi_reduction <add>, %10, %cst_7 [1] : vector<16x32xf32> to vector<16xf32>
    %12 = vector.shape_cast %11 : vector<16xf32> to vector<16x1xf32>
    %cst_8 = arith.constant 3.200000e+01 : f32
    %13 = vector.broadcast %cst_8 : f32 to vector<16x1xf32>
    %14 = arith.divf %12, %13 : vector<16x1xf32>
    %cst_9 = arith.constant 9.99999974E-6 : f32
    %15 = vector.broadcast %cst_9 : f32 to vector<16x1xf32>
    %16 = arith.addf %14, %15 : vector<16x1xf32>
    %17 = math.rsqrt %16 : vector<16x1xf32>
    %18 = vector.broadcast %17 : vector<16x1xf32> to vector<16x32xf32>
    %19 = arith.mulf %9, %18 : vector<16x32xf32>
    %20 = vector.broadcast %2 : vector<1x32xf32> to vector<16x32xf32>
    %21 = arith.mulf %19, %20 : vector<16x32xf32>
    %22 = vector.broadcast %3 : vector<1x32xf32> to vector<16x32xf32>
    %23 = arith.addf %21, %22 : vector<16x32xf32>
    %c0_10 = arith.constant 0 : index
    %c0_11 = arith.constant 0 : index
    %24 = vector.load %arg4[%c0_10, %c0_11] : memref<32x96xf32, #tpu.memory_space<vmem>>, vector<32x96xf32>
    %cst_12 = arith.constant dense<0.000000e+00> : vector<16x96xf32>
    %25 = tpu.matmul %23, %24, %cst_12 {dimension_numbers = #tpu.dot_dimension_numbers<[1], [0], [0], [1], [0, 0, 1, 1], [], []>} : vector<16x32xf32>, vector<32x96xf32>, vector<16x96xf32> -> vector<16x96xf32>
    %c0_13 = arith.constant 0 : index
    %c0_14 = arith.constant 0 : index
    %26 = vector.load %arg5[%c0_13, %c0_14] : memref<32x32xf32, #tpu.memory_space<vmem>>, vector<32x32xf32>
    %cst_15 = arith.constant 0.000000e+00 : f32
    %27 = vector.broadcast %cst_15 : f32 to vector<16x32xf32>
    %28 = vector.extract_strided_slice %25 {offsets = [0, 0], sizes = [16, 8], strides = [1, 1]} : vector<16x96xf32> to vector<16x8xf32>
    %29 = vector.extract_strided_slice %25 {offsets = [0, 32], sizes = [16, 8], strides = [1, 1]} : vector<16x96xf32> to vector<16x8xf32>
    %30 = vector.extract_strided_slice %25 {offsets = [0, 64], sizes = [16, 8], strides = [1, 1]} : vector<16x96xf32> to vector<16x8xf32>
    %cst_16 = arith.constant dense<0.000000e+00> : vector<16x16xf32>
    %31 = tpu.matmul %28, %29, %cst_16 {dimension_numbers = #tpu.dot_dimension_numbers<[1], [1], [0], [0], [0, 0, 1, 0], [], []>} : vector<16x8xf32>, vector<16x8xf32>, vector<16x16xf32> -> vector<16x16xf32>
    %cst_17 = arith.constant 0.353553385 : f32
    %32 = vector.broadcast %cst_17 : f32 to vector<16x16xf32>
    %33 = arith.mulf %31, %32 : vector<16x16xf32>
    %cst_18 = arith.constant dense<0xFF800000> : vector<16xf32>
    %34 = vector.multi_reduction <maximumf>, %33, %cst_18 [1] : vector<16x16xf32> to vector<16xf32>
    %35 = vector.shape_cast %34 : vector<16xf32> to vector<16x1xf32>
    %36 = vector.broadcast %35 : vector<16x1xf32> to vector<16x16xf32>
    %37 = arith.subf %33, %36 : vector<16x16xf32>
    %38 = math.exp %37 : vector<16x16xf32>
    %cst_19 = arith.constant dense<0.000000e+00> : vector<16xf32>
    %39 = vector.multi_reduction <add>, %38, %cst_19 [1] : vector<16x16xf32> to vector<16xf32>
    %40 = vector.shape_cast %39 : vector<16xf32> to vector<16x1xf32>
    %41 = tpu.reciprocal %40 {approx = true} : vector<16x1xf32> -> vector<16x1xf32>
    %42 = vector.broadcast %41 : vector<16x1xf32> to vector<16x16xf32>
    %43 = arith.mulf %38, %42 : vector<16x16xf32>
    %cst_20 = arith.constant dense<0.000000e+00> : vector<16x8xf32>
    %44 = tpu.matmul %43, %30, %cst_20 {dimension_numbers = #tpu.dot_dimension_numbers<[1], [0], [0], [1], [0, 0, 1, 1], [], []>} : vector<16x16xf32>, vector<16x8xf32>, vector<16x8xf32> -> vector<16x8xf32>
    %45 = vector.extract_strided_slice %26 {offsets = [0, 0], sizes = [8, 32], strides = [1, 1]} : vector<32x32xf32> to vector<8x32xf32>
    %cst_21 = arith.constant dense<0.000000e+00> : vector<16x32xf32>
    %46 = tpu.matmul %44, %45, %cst_21 {dimension_numbers = #tpu.dot_dimension_numbers<[1], [0], [0], [1], [0, 0, 1, 1], [], []>} : vector<16x8xf32>, vector<8x32xf32>, vector<16x32xf32> -> vector<16x32xf32>
    %47 = arith.addf %27, %46 : vector<16x32xf32>
    %48 = vector.extract_strided_slice %25 {offsets = [0, 8], sizes = [16, 8], strides = [1, 1]} : vector<16x96xf32> to vector<16x8xf32>
    %49 = vector.extract_strided_slice %25 {offsets = [0, 40], sizes = [16, 8], strides = [1, 1]} : vector<16x96xf32> to vector<16x8xf32>
    %50 = vector.extract_strided_slice %25 {offsets = [0, 72], sizes = [16, 8], strides = [1, 1]} : vector<16x96xf32> to vector<16x8xf32>
    %cst_22 = arith.constant dense<0.000000e+00> : vector<16x16xf32>
    %51 = tpu.matmul %48, %49, %cst_22 {dimension_numbers = #tpu.dot_dimension_numbers<[1], [1], [0], [0], [0, 0, 1, 0], [], []>} : vector<16x8xf32>, vector<16x8xf32>, vector<16x16xf32> -> vector<16x16xf32>
    %cst_23 = arith.constant 0.353553385 : f32
    %52 = vector.broadcast %cst_23 : f32 to vector<16x16xf32>
    %53 = arith.mulf %51, %52 : vector<16x16xf32>
    %cst_24 = arith.constant dense<0xFF800000> : vector<16xf32>
    %54 = vector.multi_reduction <maximumf>, %53, %cst_24 [1] : vector<16x16xf32> to vector<16xf32>
    %55 = vector.shape_cast %54 : vector<16xf32> to vector<16x1xf32>
    %56 = vector.broadcast %55 : vector<16x1xf32> to vector<16x16xf32>
    %57 = arith.subf %53, %56 : vector<16x16xf32>
    %58 = math.exp %57 : vector<16x16xf32>
    %cst_25 = arith.constant dense<0.000000e+00> : vector<16xf32>
    %59 = vector.multi_reduction <add>, %58, %cst_25 [1] : vector<16x16xf32> to vector<16xf32>
    %60 = vector.shape_cast %59 : vector<16xf32> to vector<16x1xf32>
    %61 = tpu.reciprocal %60 {approx = true} : vector<16x1xf32> -> vector<16x1xf32>
    %62 = vector.broadcast %61 : vector<16x1xf32> to vector<16x16xf32>
    %63 = arith.mulf %58, %62 : vector<16x16xf32>
    %cst_26 = arith.constant dense<0.000000e+00> : vector<16x8xf32>
    %64 = tpu.matmul %63, %50, %cst_26 {dimension_numbers = #tpu.dot_dimension_numbers<[1], [0], [0], [1], [0, 0, 1, 1], [], []>} : vector<16x16xf32>, vector<16x8xf32>, vector<16x8xf32> -> vector<16x8xf32>
    %65 = vector.extract_strided_slice %26 {offsets = [8, 0], sizes = [8, 32], strides = [1, 1]} : vector<32x32xf32> to vector<8x32xf32>
    %cst_27 = arith.constant dense<0.000000e+00> : vector<16x32xf32>
    %66 = tpu.matmul %64, %65, %cst_27 {dimension_numbers = #tpu.dot_dimension_numbers<[1], [0], [0], [1], [0, 0, 1, 1], [], []>} : vector<16x8xf32>, vector<8x32xf32>, vector<16x32xf32> -> vector<16x32xf32>
    %67 = arith.addf %47, %66 : vector<16x32xf32>
    %68 = vector.extract_strided_slice %25 {offsets = [0, 16], sizes = [16, 8], strides = [1, 1]} : vector<16x96xf32> to vector<16x8xf32>
    %69 = vector.extract_strided_slice %25 {offsets = [0, 48], sizes = [16, 8], strides = [1, 1]} : vector<16x96xf32> to vector<16x8xf32>
    %70 = vector.extract_strided_slice %25 {offsets = [0, 80], sizes = [16, 8], strides = [1, 1]} : vector<16x96xf32> to vector<16x8xf32>
    %cst_28 = arith.constant dense<0.000000e+00> : vector<16x16xf32>
    %71 = tpu.matmul %68, %69, %cst_28 {dimension_numbers = #tpu.dot_dimension_numbers<[1], [1], [0], [0], [0, 0, 1, 0], [], []>} : vector<16x8xf32>, vector<16x8xf32>, vector<16x16xf32> -> vector<16x16xf32>
    %cst_29 = arith.constant 0.353553385 : f32
    %72 = vector.broadcast %cst_29 : f32 to vector<16x16xf32>
    %73 = arith.mulf %71, %72 : vector<16x16xf32>
    %cst_30 = arith.constant dense<0xFF800000> : vector<16xf32>
    %74 = vector.multi_reduction <maximumf>, %73, %cst_30 [1] : vector<16x16xf32> to vector<16xf32>
    %75 = vector.shape_cast %74 : vector<16xf32> to vector<16x1xf32>
    %76 = vector.broadcast %75 : vector<16x1xf32> to vector<16x16xf32>
    %77 = arith.subf %73, %76 : vector<16x16xf32>
    %78 = math.exp %77 : vector<16x16xf32>
    %cst_31 = arith.constant dense<0.000000e+00> : vector<16xf32>
    %79 = vector.multi_reduction <add>, %78, %cst_31 [1] : vector<16x16xf32> to vector<16xf32>
    %80 = vector.shape_cast %79 : vector<16xf32> to vector<16x1xf32>
    %81 = tpu.reciprocal %80 {approx = true} : vector<16x1xf32> -> vector<16x1xf32>
    %82 = vector.broadcast %81 : vector<16x1xf32> to vector<16x16xf32>
    %83 = arith.mulf %78, %82 : vector<16x16xf32>
    %cst_32 = arith.constant dense<0.000000e+00> : vector<16x8xf32>
    %84 = tpu.matmul %83, %70, %cst_32 {dimension_numbers = #tpu.dot_dimension_numbers<[1], [0], [0], [1], [0, 0, 1, 1], [], []>} : vector<16x16xf32>, vector<16x8xf32>, vector<16x8xf32> -> vector<16x8xf32>
    %85 = vector.extract_strided_slice %26 {offsets = [16, 0], sizes = [8, 32], strides = [1, 1]} : vector<32x32xf32> to vector<8x32xf32>
    %cst_33 = arith.constant dense<0.000000e+00> : vector<16x32xf32>
    %86 = tpu.matmul %84, %85, %cst_33 {dimension_numbers = #tpu.dot_dimension_numbers<[1], [0], [0], [1], [0, 0, 1, 1], [], []>} : vector<16x8xf32>, vector<8x32xf32>, vector<16x32xf32> -> vector<16x32xf32>
    %87 = arith.addf %67, %86 : vector<16x32xf32>
    %88 = vector.extract_strided_slice %25 {offsets = [0, 24], sizes = [16, 8], strides = [1, 1]} : vector<16x96xf32> to vector<16x8xf32>
    %89 = vector.extract_strided_slice %25 {offsets = [0, 56], sizes = [16, 8], strides = [1, 1]} : vector<16x96xf32> to vector<16x8xf32>
    %90 = vector.extract_strided_slice %25 {offsets = [0, 88], sizes = [16, 8], strides = [1, 1]} : vector<16x96xf32> to vector<16x8xf32>
    %cst_34 = arith.constant dense<0.000000e+00> : vector<16x16xf32>
    %91 = tpu.matmul %88, %89, %cst_34 {dimension_numbers = #tpu.dot_dimension_numbers<[1], [1], [0], [0], [0, 0, 1, 0], [], []>} : vector<16x8xf32>, vector<16x8xf32>, vector<16x16xf32> -> vector<16x16xf32>
    %cst_35 = arith.constant 0.353553385 : f32
    %92 = vector.broadcast %cst_35 : f32 to vector<16x16xf32>
    %93 = arith.mulf %91, %92 : vector<16x16xf32>
    %cst_36 = arith.constant dense<0xFF800000> : vector<16xf32>
    %94 = vector.multi_reduction <maximumf>, %93, %cst_36 [1] : vector<16x16xf32> to vector<16xf32>
    %95 = vector.shape_cast %94 : vector<16xf32> to vector<16x1xf32>
    %96 = vector.broadcast %95 : vector<16x1xf32> to vector<16x16xf32>
    %97 = arith.subf %93, %96 : vector<16x16xf32>
    %98 = math.exp %97 : vector<16x16xf32>
    %cst_37 = arith.constant dense<0.000000e+00> : vector<16xf32>
    %99 = vector.multi_reduction <add>, %98, %cst_37 [1] : vector<16x16xf32> to vector<16xf32>
    %100 = vector.shape_cast %99 : vector<16xf32> to vector<16x1xf32>
    %101 = tpu.reciprocal %100 {approx = true} : vector<16x1xf32> -> vector<16x1xf32>
    %102 = vector.broadcast %101 : vector<16x1xf32> to vector<16x16xf32>
    %103 = arith.mulf %98, %102 : vector<16x16xf32>
    %cst_38 = arith.constant dense<0.000000e+00> : vector<16x8xf32>
    %104 = tpu.matmul %103, %90, %cst_38 {dimension_numbers = #tpu.dot_dimension_numbers<[1], [0], [0], [1], [0, 0, 1, 1], [], []>} : vector<16x16xf32>, vector<16x8xf32>, vector<16x8xf32> -> vector<16x8xf32>
    %105 = vector.extract_strided_slice %26 {offsets = [24, 0], sizes = [8, 32], strides = [1, 1]} : vector<32x32xf32> to vector<8x32xf32>
    %cst_39 = arith.constant dense<0.000000e+00> : vector<16x32xf32>
    %106 = tpu.matmul %104, %105, %cst_39 {dimension_numbers = #tpu.dot_dimension_numbers<[1], [0], [0], [1], [0, 0, 1, 1], [], []>} : vector<16x8xf32>, vector<8x32xf32>, vector<16x32xf32> -> vector<16x32xf32>
    %107 = arith.addf %87, %106 : vector<16x32xf32>
    %108 = arith.addf %1, %107 : vector<16x32xf32>
    %c0_40 = arith.constant 0 : index
    %c0_41 = arith.constant 0 : index
    %109 = vector.load %arg6[%c0_40, %c0_41] : memref<1x32xf32, #tpu.memory_space<vmem>>, vector<1x32xf32>
    %110 = vector.broadcast %109 : vector<1x32xf32> to vector<16x32xf32>
    %111 = arith.addf %108, %110 : vector<16x32xf32>
    %c0_42 = arith.constant 0 : index
    %c0_43 = arith.constant 0 : index
    %112 = vector.load %arg7[%c0_42, %c0_43] : memref<1x32xf32, #tpu.memory_space<vmem>>, vector<1x32xf32>
    %c0_44 = arith.constant 0 : index
    %c0_45 = arith.constant 0 : index
    %113 = vector.load %arg8[%c0_44, %c0_45] : memref<1x32xf32, #tpu.memory_space<vmem>>, vector<1x32xf32>
    %cst_46 = arith.constant dense<0.000000e+00> : vector<16xf32>
    %114 = vector.multi_reduction <add>, %111, %cst_46 [1] : vector<16x32xf32> to vector<16xf32>
    %115 = vector.shape_cast %114 : vector<16xf32> to vector<16x1xf32>
    %cst_47 = arith.constant 3.200000e+01 : f32
    %116 = vector.broadcast %cst_47 : f32 to vector<16x1xf32>
    %117 = arith.divf %115, %116 : vector<16x1xf32>
    %118 = vector.broadcast %117 : vector<16x1xf32> to vector<16x32xf32>
    %119 = arith.subf %111, %118 : vector<16x32xf32>
    %120 = arith.mulf %119, %119 : vector<16x32xf32>
    %cst_48 = arith.constant dense<0.000000e+00> : vector<16xf32>
    %121 = vector.multi_reduction <add>, %120, %cst_48 [1] : vector<16x32xf32> to vector<16xf32>
    %122 = vector.shape_cast %121 : vector<16xf32> to vector<16x1xf32>
    %cst_49 = arith.constant 3.200000e+01 : f32
    %123 = vector.broadcast %cst_49 : f32 to vector<16x1xf32>
    %124 = arith.divf %122, %123 : vector<16x1xf32>
    %cst_50 = arith.constant 9.99999974E-6 : f32
    %125 = vector.broadcast %cst_50 : f32 to vector<16x1xf32>
    %126 = arith.addf %124, %125 : vector<16x1xf32>
    %127 = math.rsqrt %126 : vector<16x1xf32>
    %128 = vector.broadcast %127 : vector<16x1xf32> to vector<16x32xf32>
    %129 = arith.mulf %119, %128 : vector<16x32xf32>
    %130 = vector.broadcast %112 : vector<1x32xf32> to vector<16x32xf32>
    %131 = arith.mulf %129, %130 : vector<16x32xf32>
    %132 = vector.broadcast %113 : vector<1x32xf32> to vector<16x32xf32>
    %133 = arith.addf %131, %132 : vector<16x32xf32>
    %c0_51 = arith.constant 0 : index
    %c0_52 = arith.constant 0 : index
    %134 = vector.load %arg9[%c0_51, %c0_52] : memref<32x64xf32, #tpu.memory_space<vmem>>, vector<32x64xf32>
    %cst_53 = arith.constant dense<0.000000e+00> : vector<16x64xf32>
    %135 = tpu.matmul %133, %134, %cst_53 {dimension_numbers = #tpu.dot_dimension_numbers<[1], [0], [0], [1], [0, 0, 1, 1], [], []>} : vector<16x32xf32>, vector<32x64xf32>, vector<16x64xf32> -> vector<16x64xf32>
    %c0_54 = arith.constant 0 : index
    %c0_55 = arith.constant 0 : index
    %136 = vector.load %arg10[%c0_54, %c0_55] : memref<1x64xf32, #tpu.memory_space<vmem>>, vector<1x64xf32>
    %137 = vector.broadcast %136 : vector<1x64xf32> to vector<16x64xf32>
    %138 = arith.addf %135, %137 : vector<16x64xf32>
    %cst_56 = arith.constant 5.000000e-01 : f32
    %139 = vector.broadcast %cst_56 : f32 to vector<16x64xf32>
    %140 = arith.mulf %139, %138 : vector<16x64xf32>
    %cst_57 = arith.constant 0.707106769 : f32
    %141 = vector.broadcast %cst_57 : f32 to vector<16x64xf32>
    %142 = arith.mulf %138, %141 : vector<16x64xf32>
    %143 = math.erf %142 : vector<16x64xf32>
    %cst_58 = arith.constant 1.000000e+00 : f32
    %144 = vector.broadcast %cst_58 : f32 to vector<16x64xf32>
    %145 = arith.addf %144, %143 : vector<16x64xf32>
    %146 = arith.mulf %140, %145 : vector<16x64xf32>
    %c0_59 = arith.constant 0 : index
    %c0_60 = arith.constant 0 : index
    %147 = vector.load %arg11[%c0_59, %c0_60] : memref<64x32xf32, #tpu.memory_space<vmem>>, vector<64x32xf32>
    %cst_61 = arith.constant dense<0.000000e+00> : vector<16x32xf32>
    %148 = tpu.matmul %146, %147, %cst_61 {dimension_numbers = #tpu.dot_dimension_numbers<[1], [0], [0], [1], [0, 0, 1, 1], [], []>} : vector<16x64xf32>, vector<64x32xf32>, vector<16x32xf32> -> vector<16x32xf32>
    %c0_62 = arith.constant 0 : index
    %c0_63 = arith.constant 0 : index
    %149 = vector.load %arg12[%c0_62, %c0_63] : memref<1x32xf32, #tpu.memory_space<vmem>>, vector<1x32xf32>
    %150 = vector.broadcast %149 : vector<1x32xf32> to vector<16x32xf32>
    %151 = arith.addf %148, %150 : vector<16x32xf32>
    %152 = arith.addf %133, %151 : vector<16x32xf32>
    %153 = vector.shape_cast %152 : vector<16x32xf32> to vector<1x16x32xf32>
    %c0_64 = arith.constant 0 : index
    %c0_65 = arith.constant 0 : index
    %c0_66 = arith.constant 0 : index
    %154 = vector.load %arg13[%c0_64, %c0_65, %c0_66] : memref<1x16x32xf32, #tpu.memory_space<vmem>>, vector<1x16x32xf32>
    tpu.vector_store %arg13[%c0_64, %c0_65, %c0_66], %153 {strides = array<i32>} : memref<1x16x32xf32, #tpu.memory_space<vmem>>, vector<1x16x32xf32>,
    return
  }
  func.func @transform_0(%arg0: i32) -> (i32, i32, i32) {
    %c0_i32 = arith.constant 0 : i32
    %c0_i32_0 = arith.constant 0 : i32
    %c0_i32_1 = arith.constant 0 : i32
    return %arg0, %c0_i32, %c0_i32_0 : i32, i32, i32
  }
  func.func @transform_1(%arg0: i32) -> (i32, i32) {
    %c0_i32 = arith.constant 0 : i32
    %c0_i32_0 = arith.constant 0 : i32
    %c0_i32_1 = arith.constant 0 : i32
    return %c0_i32, %c0_i32_0 : i32, i32
  }
  func.func @transform_2(%arg0: i32) -> (i32, i32) {
    %c0_i32 = arith.constant 0 : i32
    %c0_i32_0 = arith.constant 0 : i32
    %c0_i32_1 = arith.constant 0 : i32
    return %c0_i32, %c0_i32_0 : i32, i32
  }
  func.func @transform_3(%arg0: i32) -> (i32, i32) {
    %c0_i32 = arith.constant 0 : i32
    %c0_i32_0 = arith.constant 0 : i32
    %c0_i32_1 = arith.constant 0 : i32
    return %c0_i32, %c0_i32_0 : i32, i32
  }
  func.func @transform_4(%arg0: i32) -> (i32, i32) {
    %c0_i32 = arith.constant 0 : i32
    %c0_i32_0 = arith.constant 0 : i32
    %c0_i32_1 = arith.constant 0 : i32
    return %c0_i32, %c0_i32_0 : i32, i32
  }
  func.func @transform_5(%arg0: i32) -> (i32, i32) {
    %c0_i32 = arith.constant 0 : i32
    %c0_i32_0 = arith.constant 0 : i32
    %c0_i32_1 = arith.constant 0 : i32
    return %c0_i32, %c0_i32_0 : i32, i32
  }
  func.func @transform_6(%arg0: i32) -> (i32, i32) {
    %c0_i32 = arith.constant 0 : i32
    %c0_i32_0 = arith.constant 0 : i32
    %c0_i32_1 = arith.constant 0 : i32
    return %c0_i32, %c0_i32_0 : i32, i32
  }
  func.func @transform_7(%arg0: i32) -> (i32, i32) {
    %c0_i32 = arith.constant 0 : i32
    %c0_i32_0 = arith.constant 0 : i32
    %c0_i32_1 = arith.constant 0 : i32
    return %c0_i32, %c0_i32_0 : i32, i32
  }
  func.func @transform_8(%arg0: i32) -> (i32, i32) {
    %c0_i32 = arith.constant 0 : i32
    %c0_i32_0 = arith.constant 0 : i32
    %c0_i32_1 = arith.constant 0 : i32
    return %c0_i32, %c0_i32_0 : i32, i32
  }
  func.func @transform_9(%arg0: i32) -> (i32, i32) {
    %c0_i32 = arith.constant 0 : i32
    %c0_i32_0 = arith.constant 0 : i32
    %c0_i32_1 = arith.constant 0 : i32
    return %c0_i32, %c0_i32_0 : i32, i32
  }
  func.func @transform_10(%arg0: i32) -> (i32, i32) {
    %c0_i32 = arith.constant 0 : i32
    %c0_i32_0 = arith.constant 0 : i32
    %c0_i32_1 = arith.constant 0 : i32
    return %c0_i32, %c0_i32_0 : i32, i32
  }
  func.func @transform_11(%arg0: i32) -> (i32, i32) {
    %c0_i32 = arith.constant 0 : i32
    %c0_i32_0 = arith.constant 0 : i32
    %c0_i32_1 = arith.constant 0 : i32
    return %c0_i32, %c0_i32_0 : i32, i32
  }
  func.func @transform_12(%arg0: i32) -> (i32, i32, i32) {
    %c0_i32 = arith.constant 0 : i32
    %c0_i32_0 = arith.constant 0 : i32
    %c0_i32_1 = arith.constant 0 : i32
    return %arg0, %c0_i32, %c0_i32_0 : i32, i32, i32
  }
}

module attributes {stable_mosaic.version = 11 : i64} {
  func.func @_conv_relu_pool_kernel(%arg0: i32, %arg1: memref<1x144x144xf32, #tpu.memory_space<vmem>>, %arg2: memref<144x32xf32, #tpu.memory_space<vmem>>, %arg3: memref<1x16x32xf32, #tpu.memory_space<vmem>>, %arg4: memref<1x16x32xf32, #tpu.memory_space<vmem>>) attributes {dimension_semantics = [#tpu.dimension_semantics<parallel>], iteration_bounds = array<i64: 2>, scalar_prefetch = 0 : i64, scratch_operands = 0 : i64, tpu.core_type = #tpu.core_type<tc>, window_params = [{transform_indices = @transform_0, window_bounds = array<i64: 1, 144, 144>}, {pipeline_mode = #tpu.pipeline_mode<synchronous>, transform_indices = @transform_1, window_bounds = array<i64: 144, 32>}, {pipeline_mode = #tpu.pipeline_mode<synchronous>, transform_indices = @transform_2, window_bounds = array<i64: 1, 16, 32>}, {transform_indices = @transform_3, window_bounds = array<i64: 1, 16, 32>}]} {
    %c0 = arith.constant 0 : index
    %c0_0 = arith.constant 0 : index
    %c0_1 = arith.constant 0 : index
    %0 = vector.load %arg1[%c0, %c0_0, %c0_1] : memref<1x144x144xf32, #tpu.memory_space<vmem>>, vector<1x144x144xf32>
    %1 = vector.shape_cast %0 : vector<1x144x144xf32> to vector<144x144xf32>
    %c0_2 = arith.constant 0 : index
    %c0_3 = arith.constant 0 : index
    %2 = vector.load %arg2[%c0_2, %c0_3] : memref<144x32xf32, #tpu.memory_space<vmem>>, vector<144x32xf32>
    %cst = arith.constant dense<0.000000e+00> : vector<144x32xf32>
    %3 = tpu.matmul %1, %2, %cst {dimension_numbers = #tpu.dot_dimension_numbers<[1], [0], [0], [1], [0, 0, 1, 1], [], []>} : vector<144x144xf32>, vector<144x32xf32>, vector<144x32xf32> -> vector<144x32xf32>
    %cst_4 = arith.constant 0.000000e+00 : f32
    %4 = vector.broadcast %cst_4 : f32 to vector<144x32xf32>
    %5 = arith.maximumf %3, %4 : vector<144x32xf32>
    %6 = vector.extract_strided_slice %5 {offsets = [0, 0], sizes = [16, 32], strides = [1, 1]} : vector<144x32xf32> to vector<16x32xf32>
    %7 = vector.extract_strided_slice %5 {offsets = [16, 0], sizes = [16, 32], strides = [1, 1]} : vector<144x32xf32> to vector<16x32xf32>
    %8 = arith.maximumf %6, %7 : vector<16x32xf32>
    %9 = vector.extract_strided_slice %5 {offsets = [32, 0], sizes = [16, 32], strides = [1, 1]} : vector<144x32xf32> to vector<16x32xf32>
    %10 = arith.maximumf %8, %9 : vector<16x32xf32>
    %11 = vector.extract_strided_slice %5 {offsets = [48, 0], sizes = [16, 32], strides = [1, 1]} : vector<144x32xf32> to vector<16x32xf32>
    %12 = arith.maximumf %10, %11 : vector<16x32xf32>
    %13 = vector.extract_strided_slice %5 {offsets = [64, 0], sizes = [16, 32], strides = [1, 1]} : vector<144x32xf32> to vector<16x32xf32>
    %14 = arith.maximumf %12, %13 : vector<16x32xf32>
    %15 = vector.extract_strided_slice %5 {offsets = [80, 0], sizes = [16, 32], strides = [1, 1]} : vector<144x32xf32> to vector<16x32xf32>
    %16 = arith.maximumf %14, %15 : vector<16x32xf32>
    %17 = vector.extract_strided_slice %5 {offsets = [96, 0], sizes = [16, 32], strides = [1, 1]} : vector<144x32xf32> to vector<16x32xf32>
    %18 = arith.maximumf %16, %17 : vector<16x32xf32>
    %19 = vector.extract_strided_slice %5 {offsets = [112, 0], sizes = [16, 32], strides = [1, 1]} : vector<144x32xf32> to vector<16x32xf32>
    %20 = arith.maximumf %18, %19 : vector<16x32xf32>
    %21 = vector.extract_strided_slice %5 {offsets = [128, 0], sizes = [16, 32], strides = [1, 1]} : vector<144x32xf32> to vector<16x32xf32>
    %22 = arith.maximumf %20, %21 : vector<16x32xf32>
    %c0_5 = arith.constant 0 : index
    %c0_6 = arith.constant 0 : index
    %c0_7 = arith.constant 0 : index
    %23 = vector.load %arg3[%c0_5, %c0_6, %c0_7] : memref<1x16x32xf32, #tpu.memory_space<vmem>>, vector<1x16x32xf32>
    %24 = vector.shape_cast %23 : vector<1x16x32xf32> to vector<16x32xf32>
    %25 = arith.addf %22, %24 : vector<16x32xf32>
    %26 = vector.shape_cast %25 : vector<16x32xf32> to vector<1x16x32xf32>
    %c0_8 = arith.constant 0 : index
    %c0_9 = arith.constant 0 : index
    %c0_10 = arith.constant 0 : index
    %27 = vector.load %arg4[%c0_8, %c0_9, %c0_10] : memref<1x16x32xf32, #tpu.memory_space<vmem>>, vector<1x16x32xf32>
    tpu.vector_store %arg4[%c0_8, %c0_9, %c0_10], %26 {strides = array<i32>} : memref<1x16x32xf32, #tpu.memory_space<vmem>>, vector<1x16x32xf32>,
    return
  }
  func.func @transform_0(%arg0: i32) -> (i32, i32, i32) {
    %c0_i32 = arith.constant 0 : i32
    %c0_i32_0 = arith.constant 0 : i32
    %c0_i32_1 = arith.constant 0 : i32
    return %arg0, %c0_i32, %c0_i32_0 : i32, i32, i32
  }
  func.func @transform_1(%arg0: i32) -> (i32, i32) {
    %c0_i32 = arith.constant 0 : i32
    %c0_i32_0 = arith.constant 0 : i32
    %c0_i32_1 = arith.constant 0 : i32
    return %c0_i32, %c0_i32_0 : i32, i32
  }
  func.func @transform_2(%arg0: i32) -> (i32, i32, i32) {
    %c0_i32 = arith.constant 0 : i32
    %c0_i32_0 = arith.constant 0 : i32
    %c0_i32_1 = arith.constant 0 : i32
    %c0_i32_2 = arith.constant 0 : i32
    return %c0_i32, %c0_i32_0, %c0_i32_1 : i32, i32, i32
  }
  func.func @transform_3(%arg0: i32) -> (i32, i32, i32) {
    %c0_i32 = arith.constant 0 : i32
    %c0_i32_0 = arith.constant 0 : i32
    %c0_i32_1 = arith.constant 0 : i32
    return %arg0, %c0_i32, %c0_i32_0 : i32, i32, i32
  }
}

module attributes {stable_mosaic.version = 11 : i64} {
  func.func @_head_kernel(%arg0: i32, %arg1: memref<1x16x32xf32, #tpu.memory_space<vmem>>, %arg2: memref<1x32xf32, #tpu.memory_space<vmem>>, %arg3: memref<1x32xf32, #tpu.memory_space<vmem>>, %arg4: memref<32x1xf32, #tpu.memory_space<vmem>>, %arg5: memref<1x1xf32, #tpu.memory_space<vmem>>, %arg6: memref<32x10xf32, #tpu.memory_space<vmem>>, %arg7: memref<1x10xf32, #tpu.memory_space<vmem>>, %arg8: memref<1x1x10xf32, #tpu.memory_space<vmem>>) attributes {dimension_semantics = [#tpu.dimension_semantics<parallel>], iteration_bounds = array<i64: 2>, scalar_prefetch = 0 : i64, scratch_operands = 0 : i64, tpu.core_type = #tpu.core_type<tc>, window_params = [{transform_indices = @transform_0, window_bounds = array<i64: 1, 16, 32>}, {pipeline_mode = #tpu.pipeline_mode<synchronous>, transform_indices = @transform_1, window_bounds = array<i64: 1, 32>}, {pipeline_mode = #tpu.pipeline_mode<synchronous>, transform_indices = @transform_2, window_bounds = array<i64: 1, 32>}, {pipeline_mode = #tpu.pipeline_mode<synchronous>, transform_indices = @transform_3, window_bounds = array<i64: 32, 1>}, {pipeline_mode = #tpu.pipeline_mode<synchronous>, transform_indices = @transform_4, window_bounds = array<i64: 1, 1>}, {pipeline_mode = #tpu.pipeline_mode<synchronous>, transform_indices = @transform_5, window_bounds = array<i64: 32, 10>}, {pipeline_mode = #tpu.pipeline_mode<synchronous>, transform_indices = @transform_6, window_bounds = array<i64: 1, 10>}, {transform_indices = @transform_7, window_bounds = array<i64: 1, 1, 10>}]} {
    %c0 = arith.constant 0 : index
    %c0_0 = arith.constant 0 : index
    %c0_1 = arith.constant 0 : index
    %0 = vector.load %arg1[%c0, %c0_0, %c0_1] : memref<1x16x32xf32, #tpu.memory_space<vmem>>, vector<1x16x32xf32>
    %1 = vector.shape_cast %0 : vector<1x16x32xf32> to vector<16x32xf32>
    %cst = arith.constant dense<0.000000e+00> : vector<16xf32>
    %2 = vector.multi_reduction <add>, %1, %cst [1] : vector<16x32xf32> to vector<16xf32>
    %3 = vector.shape_cast %2 : vector<16xf32> to vector<16x1xf32>
    %cst_2 = arith.constant 3.200000e+01 : f32
    %4 = vector.broadcast %cst_2 : f32 to vector<16x1xf32>
    %5 = arith.divf %3, %4 : vector<16x1xf32>
    %6 = vector.broadcast %5 : vector<16x1xf32> to vector<16x32xf32>
    %7 = arith.subf %1, %6 : vector<16x32xf32>
    %8 = arith.mulf %7, %7 : vector<16x32xf32>
    %cst_3 = arith.constant dense<0.000000e+00> : vector<16xf32>
    %9 = vector.multi_reduction <add>, %8, %cst_3 [1] : vector<16x32xf32> to vector<16xf32>
    %10 = vector.shape_cast %9 : vector<16xf32> to vector<16x1xf32>
    %cst_4 = arith.constant 3.200000e+01 : f32
    %11 = vector.broadcast %cst_4 : f32 to vector<16x1xf32>
    %12 = arith.divf %10, %11 : vector<16x1xf32>
    %cst_5 = arith.constant 9.99999974E-6 : f32
    %13 = vector.broadcast %cst_5 : f32 to vector<16x1xf32>
    %14 = arith.addf %12, %13 : vector<16x1xf32>
    %15 = math.rsqrt %14 : vector<16x1xf32>
    %16 = vector.broadcast %15 : vector<16x1xf32> to vector<16x32xf32>
    %17 = arith.mulf %7, %16 : vector<16x32xf32>
    %c0_6 = arith.constant 0 : index
    %c0_7 = arith.constant 0 : index
    %18 = vector.load %arg2[%c0_6, %c0_7] : memref<1x32xf32, #tpu.memory_space<vmem>>, vector<1x32xf32>
    %19 = vector.broadcast %18 : vector<1x32xf32> to vector<16x32xf32>
    %20 = arith.mulf %17, %19 : vector<16x32xf32>
    %c0_8 = arith.constant 0 : index
    %c0_9 = arith.constant 0 : index
    %21 = vector.load %arg3[%c0_8, %c0_9] : memref<1x32xf32, #tpu.memory_space<vmem>>, vector<1x32xf32>
    %22 = vector.broadcast %21 : vector<1x32xf32> to vector<16x32xf32>
    %23 = arith.addf %20, %22 : vector<16x32xf32>
    %c0_10 = arith.constant 0 : index
    %c0_11 = arith.constant 0 : index
    %24 = vector.load %arg4[%c0_10, %c0_11] : memref<32x1xf32, #tpu.memory_space<vmem>>, vector<32x1xf32>
    %cst_12 = arith.constant dense<0.000000e+00> : vector<16x1xf32>
    %25 = tpu.matmul %23, %24, %cst_12 {dimension_numbers = #tpu.dot_dimension_numbers<[1], [0], [0], [1], [0, 0, 1, 1], [], []>} : vector<16x32xf32>, vector<32x1xf32>, vector<16x1xf32> -> vector<16x1xf32>
    %c0_13 = arith.constant 0 : index
    %c0_14 = arith.constant 0 : index
    %26 = vector.load %arg5[%c0_13, %c0_14] : memref<1x1xf32, #tpu.memory_space<vmem>>, vector<1x1xf32>
    %27 = vector.broadcast %26 : vector<1x1xf32> to vector<16x1xf32>
    %28 = arith.addf %25, %27 : vector<16x1xf32>
    %cst_15 = arith.constant dense<0xFF800000> : vector<1xf32>
    %29 = vector.multi_reduction <maximumf>, %28, %cst_15 [0] : vector<16x1xf32> to vector<1xf32>
    %30 = vector.shape_cast %29 : vector<1xf32> to vector<1x1xf32>
    %31 = vector.broadcast %30 : vector<1x1xf32> to vector<16x1xf32>
    %32 = arith.subf %28, %31 : vector<16x1xf32>
    %33 = math.exp %32 : vector<16x1xf32>
    %cst_16 = arith.constant dense<0.000000e+00> : vector<1xf32>
    %34 = vector.multi_reduction <add>, %33, %cst_16 [0] : vector<16x1xf32> to vector<1xf32>
    %35 = vector.shape_cast %34 : vector<1xf32> to vector<1x1xf32>
    %36 = tpu.reciprocal %35 {approx = true} : vector<1x1xf32> -> vector<1x1xf32>
    %37 = vector.broadcast %36 : vector<1x1xf32> to vector<16x1xf32>
    %38 = arith.mulf %33, %37 : vector<16x1xf32>
    %39 = vector.broadcast %38 : vector<16x1xf32> to vector<16x32xf32>
    %40 = arith.mulf %23, %39 : vector<16x32xf32>
    %cst_17 = arith.constant dense<0.000000e+00> : vector<32xf32>
    %41 = vector.multi_reduction <add>, %40, %cst_17 [0] : vector<16x32xf32> to vector<32xf32>
    %42 = vector.shape_cast %41 : vector<32xf32> to vector<1x32xf32>
    %c0_18 = arith.constant 0 : index
    %c0_19 = arith.constant 0 : index
    %43 = vector.load %arg6[%c0_18, %c0_19] : memref<32x10xf32, #tpu.memory_space<vmem>>, vector<32x10xf32>
    %cst_20 = arith.constant dense<0.000000e+00> : vector<1x10xf32>
    %44 = tpu.matmul %42, %43, %cst_20 {dimension_numbers = #tpu.dot_dimension_numbers<[1], [0], [0], [1], [0, 0, 1, 1], [], []>} : vector<1x32xf32>, vector<32x10xf32>, vector<1x10xf32> -> vector<1x10xf32>
    %c0_21 = arith.constant 0 : index
    %c0_22 = arith.constant 0 : index
    %45 = vector.load %arg7[%c0_21, %c0_22] : memref<1x10xf32, #tpu.memory_space<vmem>>, vector<1x10xf32>
    %46 = arith.addf %44, %45 : vector<1x10xf32>
    %47 = vector.shape_cast %46 : vector<1x10xf32> to vector<1x1x10xf32>
    %c0_23 = arith.constant 0 : index
    %c0_24 = arith.constant 0 : index
    %c0_25 = arith.constant 0 : index
    %48 = vector.load %arg8[%c0_23, %c0_24, %c0_25] : memref<1x1x10xf32, #tpu.memory_space<vmem>>, vector<1x1x10xf32>
    tpu.vector_store %arg8[%c0_23, %c0_24, %c0_25], %47 {strides = array<i32>} : memref<1x1x10xf32, #tpu.memory_space<vmem>>, vector<1x1x10xf32>,
    return
  }
  func.func @transform_0(%arg0: i32) -> (i32, i32, i32) {
    %c0_i32 = arith.constant 0 : i32
    %c0_i32_0 = arith.constant 0 : i32
    %c0_i32_1 = arith.constant 0 : i32
    return %arg0, %c0_i32, %c0_i32_0 : i32, i32, i32
  }
  func.func @transform_1(%arg0: i32) -> (i32, i32) {
    %c0_i32 = arith.constant 0 : i32
    %c0_i32_0 = arith.constant 0 : i32
    %c0_i32_1 = arith.constant 0 : i32
    return %c0_i32, %c0_i32_0 : i32, i32
  }
  func.func @transform_2(%arg0: i32) -> (i32, i32) {
    %c0_i32 = arith.constant 0 : i32
    %c0_i32_0 = arith.constant 0 : i32
    %c0_i32_1 = arith.constant 0 : i32
    return %c0_i32, %c0_i32_0 : i32, i32
  }
  func.func @transform_3(%arg0: i32) -> (i32, i32) {
    %c0_i32 = arith.constant 0 : i32
    %c0_i32_0 = arith.constant 0 : i32
    %c0_i32_1 = arith.constant 0 : i32
    return %c0_i32, %c0_i32_0 : i32, i32
  }
  func.func @transform_4(%arg0: i32) -> (i32, i32) {
    %c0_i32 = arith.constant 0 : i32
    %c0_i32_0 = arith.constant 0 : i32
    %c0_i32_1 = arith.constant 0 : i32
    return %c0_i32, %c0_i32_0 : i32, i32
  }
  func.func @transform_5(%arg0: i32) -> (i32, i32) {
    %c0_i32 = arith.constant 0 : i32
    %c0_i32_0 = arith.constant 0 : i32
    %c0_i32_1 = arith.constant 0 : i32
    return %c0_i32, %c0_i32_0 : i32, i32
  }
  func.func @transform_6(%arg0: i32) -> (i32, i32) {
    %c0_i32 = arith.constant 0 : i32
    %c0_i32_0 = arith.constant 0 : i32
    %c0_i32_1 = arith.constant 0 : i32
    return %c0_i32, %c0_i32_0 : i32, i32
  }
  func.func @transform_7(%arg0: i32) -> (i32, i32, i32) {
    %c0_i32 = arith.constant 0 : i32
    %c0_i32_0 = arith.constant 0 : i32
    %c0_i32_1 = arith.constant 0 : i32
    return %arg0, %c0_i32, %c0_i32_0 : i32, i32, i32
  }
}

</mosaic_0001>

<bundles_post_ra>
// kernel: cct_forward.5
= control target key start
LH: loop header
LB: loop body
LE: loop exit
PB: predicated region body
PF: predicated region fallthrough
CT: control target
= control target key end

     0   :  { %s1436_s12 = smov 0   ;;  %s1863_s0 = inlined_call_operand.vmem [shape: f32[2,576,36], index: 0, kind: input, shape index: {}]   ;;  %s1864_s1 = inlined_call_operand.vmem [shape: f32[36,16], index: 1, kind: input, shape index: {}]   ;;  %s1865_s2 = inlined_call_operand.vmem [shape: f32[1,64,16], index: 2, kind: input, shape index: {}]   ;;  %s1866_s3 = inlined_call_operand.vmem [shape: f32[2,64,16], index: 3, kind: output, shape index: {}]  }
   0x1 LB: > { %s1110_s13 = sadd.s32 4294967295, %s1414_s12   ;;  %p1114_p0 = scmp.ge.s32.totalorder %s1414_s12, 1  ;;  %s1414_s12 = sphi %s1436_s12, %s13_s12  }
   0x2   : > { %p137_p1 = scmp.lt.s32.totalorder %s1414_s12, 3 }
   0x4   : > { %p138_p2 = pnand %p1114_p0, %p137_p1 }
   0x5   : > { %p161_p3 = scmp.lt.s32.totalorder (!%p138_p2), %s1110_s13, 1 }
   0x6   : > { %141 = sbr.rel (%p138_p2) target bundleno = 303 (0x12f), region = 32 }
   0xb   : > { %v247_v0 = vld [vmem:[%s1864_s1 + $0x20] sm:$0xf]  ;;  %vm465_vm0 = vcmask 1043456   ;;  %v246_v1 = vld [vmem:[%s1864_s1 + $0x18] sm:$0xff]  ;;  %v245_v2 = vld [vmem:[%s1864_s1 + $0x10] sm:$0xff]  ;;  %s1884_s13 = smov (!%p161_p3, %s1110_s13), 1 }
   0xc   : > { %1271 = vmatprep.subr.msk.mxu0 %vm465_vm0, %v247_v0  ;;  %1389 = vmatprep.subr.msk.mxu1 %vm465_vm0, %v247_v0  ;;  %v244_v3 = vld [vmem:[%s1864_s1 + $0x8] sm:$0xff]  ;;  %s1399_s22 = smul.u32 576, %s1884_s13  ;;  %v243_v4 = vld [vmem:[%s1864_s1] sm:$0xff]  ;;  %vm248_vm1 = vcmask 293888   ;;  %vm1046_vm2 = vcmask 130048   ;;  %s1193_s28 = sshll.u32 %s1884_s13, 6 }
   0xd   : > { %1272 = vmatpush3.msk.msra.mxu0 %vm465_vm0, %v247_v0  ;;  %1394 = vmatpush3.msk.msra.mxu1 %vm465_vm0, %v247_v0  ;;  %s1796_s6 = scalar_lea.vmem %s1866_s3, %s1193_s28 }
   0xe   : > { %1273 = vmatprep.subr.mxu0 %v246_v1  ;;  %1390 = vmatprep.subr.mxu1 %v246_v1  ;;  %s1465_s27 = scalar_lea.vmem %s1863_s0, %s1399_s22 }
   0xf   : > { %1274 = vmatpush3.msra.mxu0 %v246_v1  ;;  %1395 = vmatpush3.msra.mxu1 %v246_v1  ;;  %v171_v5 = vld [vmem:[%s1465_s27] sm:$0xff]  ;;  %v172_v6 = vld [vmem:[%s1465_s27 + $0x8] sm:$0xff]  ;;  %v173_v8 = vld [vmem:[%s1465_s27 + $0x10] sm:$0xff] }
  0x10   : > { %1275 = vmatprep.subr.mxu0 %v245_v2  ;;  %1391 = vmatprep.subr.mxu1 %v245_v2  ;;  %v207_v7 = vld [vmem:[%s1465_s27 + $0x120] sm:$0xff]  ;;  %v208_v9 = vld [vmem:[%s1465_s27 + $0x128] sm:$0xff]  ;;  %v209_v10 = vld [vmem:[%s1465_s27 + $0x130] sm:$0xff] }
  0x11   : > { %1276 = vmatpush3.msra.mxu0 %v245_v2  ;;  %1396 = vmatpush3.msra.mxu1 %v245_v2  ;;  %v174_v11 = vld [vmem:[%s1465_s27 + $0x18] sm:$0xff]  ;;  %v175_v12 = vld [vmem:[%s1465_s27 + $0x20] sm:$0xff]  ;;  %v176_v15 = vld [vmem:[%s1465_s27 + $0x28] sm:$0xff] }
  0x12   : > { %1277 = vmatprep.subr.mxu0 %v244_v3  ;;  %1392 = vmatprep.subr.mxu1 %v244_v3  ;;  %v210_v13 = vld [vmem:[%s1465_s27 + $0x138] sm:$0xff]  ;;  %v211_v14 = vld [vmem:[%s1465_s27 + $0x140] sm:$0xff]  ;;  %v177_v16 = vld [vmem:[%s1465_s27 + $0x30] sm:$0xff] }
  0x13   : > { %1278 = vmatpush3.msra.mxu0 %v244_v3  ;;  %1397 = vmatpush3.msra.mxu1 %v244_v3  ;;  %v212_v17 = vld [vmem:[%s1465_s27 + $0x148] sm:$0xff]  ;;  %v213_v18 = vld [vmem:[%s1465_s27 + $0x150] sm:$0xff]  ;;  %v178_v19 = vld [vmem:[%s1465_s27 + $0x38] sm:$0xff] }
  0x14   : > { %1279 = vmatprep.subr.mxu0 %v243_v4  ;;  %1281 = vmatprep.mubr.msk.f32.mxu0 %vm248_vm1, %v171_v5  ;;  %v179_v20 = vld [vmem:[%s1465_s27 + $0x40] sm:$0xff]  ;;  %v214_v21 = vld [vmem:[%s1465_s27 + $0x158] sm:$0xff]  ;;  %v180_v23 = vld [vmem:[%s1465_s27 + $0x48] sm:$0xff] }
  0x15   : > { %1280 = vmatpush3.msra.mxu0 %v243_v4  ;;  %1393 = vmatprep.subr.mxu1 %v243_v4  ;;  %v215_v22 = vld [vmem:[%s1465_s27 + $0x160] sm:$0xff]  ;;  %v181_v24 = vld [vmem:[%s1465_s27 + $0x50] sm:$0xff]  ;;  %v216_v25 = vld [vmem:[%s1465_s27 + $0x168] sm:$0xff] }
  0x16   : > { %1282 = vmatmul.mubr.msk.f32.vlgmr.msra.gmra.mxu0 %vm248_vm1, %v172_v6  ;;  %1398 = vmatpush3.msra.mxu1 %v243_v4  ;;  %v217_v26 = vld [vmem:[%s1465_s27 + $0x170] sm:$0xff]  ;;  %v182_v27 = vld [vmem:[%s1465_s27 + $0x58] sm:$0xff]  ;;  %v183_v28 = vld [vmem:[%s1465_s27 + $0x60] sm:$0xff] }
  0x17   : > { %1335 = vmatprep.mubr.msk.f32.mxu1 %vm248_vm1, %v207_v7  ;;  %1284 = vmatprep.mubr.msk.f32.mxu0 %vm248_vm1, %v173_v8  ;;  %v218_v29 = vld [vmem:[%s1465_s27 + $0x178] sm:$0xff]  ;;  %v219_v30 = vld [vmem:[%s1465_s27 + $0x180] sm:$0xff]  ;;  %v184_v31 = vld [vmem:[%s1465_s27 + $0x68] sm:$0xff] }
  0x18   : > { %1336 = vmatmul.mubr.msk.f32.vlgmr.msra.gmra.mxu1 %vm248_vm1, %v208_v9  ;;  %v185_v32 = vld [vmem:[%s1465_s27 + $0x70] sm:$0xff]  ;;  %v220_v33 = vld [vmem:[%s1465_s27 + $0x188] sm:$0xff]  ;;  %v186_v35 = vld [vmem:[%s1465_s27 + $0x78] sm:$0xff] }
  0x19   : > { %1338 = vmatprep.mubr.msk.f32.mxu1 %vm248_vm1, %v209_v10  ;;  %v221_v34 = vld [vmem:[%s1465_s27 + $0x190] sm:$0xff]  ;;  %v187_v36 = vld [vmem:[%s1465_s27 + $0x80] sm:$0xff]  ;;  %v222_v37 = vld [vmem:[%s1465_s27 + $0x198] sm:$0xff] }
  0x1a   : > { %1285 = vmatmul.mubr.msk.f32.gmra.mxu0 %vm248_vm1, %v174_v11  ;;  %v223_v38 = vld [vmem:[%s1465_s27 + $0x1a0] sm:$0xff]  ;;  %v188_v39 = vld [vmem:[%s1465_s27 + $0x88] sm:$0xff]  ;;  %v189_v40 = vld [vmem:[%s1465_s27 + $0x90] sm:$0xff] }
  0x1b   : > { %1287 = vmatprep.mubr.msk.f32.mxu0 %vm248_vm1, %v175_v12  ;;  %v224_v41 = vld [vmem:[%s1465_s27 + $0x1a8] sm:$0xff]  ;;  %v225_v42 = vld [vmem:[%s1465_s27 + $0x1b0] sm:$0xff]  ;;  %v190_v43 = vld [vmem:[%s1465_s27 + $0x98] sm:$0xff] }
  0x1c   : > { %1339 = vmatmul.mubr.msk.f32.gmra.mxu1 %vm248_vm1, %v210_v13  ;;  %v191_v44 = vld [vmem:[%s1465_s27 + $0xa0] sm:$0xff]  ;;  %v226_v45 = vld [vmem:[%s1465_s27 + $0x1b8] sm:$0xff]  ;;  %v192_v47 = vld [vmem:[%s1465_s27 + $0xa8] sm:$0xff] }
  0x1d   : > { %1341 = vmatprep.mubr.msk.f32.mxu1 %vm248_vm1, %v211_v14  ;;  %v227_v46 = vld [vmem:[%s1465_s27 + $0x1c0] sm:$0xff]  ;;  %v193_v48 = vld [vmem:[%s1465_s27 + $0xb0] sm:$0xff]  ;;  %v228_v49 = vld [vmem:[%s1465_s27 + $0x1c8] sm:$0xff] }
  0x1e   : > { %1288 = vmatmul.mubr.msk.f32.gmra.mxu0 %vm248_vm1, %v176_v15  ;;  %v229_v50 = vld [vmem:[%s1465_s27 + $0x1d0] sm:$0xff]  ;;  %v194_v51 = vld [vmem:[%s1465_s27 + $0xb8] sm:$0xff]  ;;  %v195_v52 = vld [vmem:[%s1465_s27 + $0xc0] sm:$0xff] }
  0x1f   : > { %1290 = vmatprep.mubr.msk.f32.mxu0 %vm248_vm1, %v177_v16  ;;  %v230_v53 = vld [vmem:[%s1465_s27 + $0x1d8] sm:$0xff]  ;;  %v231_v54 = vld [vmem:[%s1465_s27 + $0x1e0] sm:$0xff]  ;;  %v196_v55 = vld [vmem:[%s1465_s27 + $0xc8] sm:$0xff] }
  0x20   : > { %1342 = vmatmul.mubr.msk.f32.gmra.mxu1 %vm248_vm1, %v212_v17  ;;  %v197_v56 = vld [vmem:[%s1465_s27 + $0xd0] sm:$0xff]  ;;  %v232_v57 = vld [vmem:[%s1465_s27 + $0x1e8] sm:$0xff]  ;;  %v198_v59 = vld [vmem:[%s1465_s27 + $0xd8] sm:$0xff] }
  0x21   : > { %1344 = vmatprep.mubr.msk.f32.mxu1 %vm248_vm1, %v213_v18  ;;  %v233_v58 = vld [vmem:[%s1465_s27 + $0x1f0] sm:$0xff]  ;;  %v199_v60 = vld [vmem:[%s1465_s27 + $0xe0] sm:$0xff]  ;;  %v234_v61 = vld [vmem:[%s1465_s27 + $0x1f8] sm:$0xff] }
  0x22   : > { %1291 = vmatmul.mubr.msk.f32.gmra.mxu0 %vm248_vm1, %v178_v19  ;;  %v235_v62 = vld [vmem:[%s1465_s27 + $0x200] sm:$0xff]  ;;  %v200_v63 = vld [vmem:[%s1465_s27 + $0xe8] sm:$0xff]  ;;  %v201_v0 = vld [vmem:[%s1465_s27 + $0xf0] sm:$0xff] }
  0x23   : > { %1293 = vmatprep.mubr.msk.f32.mxu0 %vm248_vm1, %v179_v20  ;;  %v236_v1 = vld [vmem:[%s1465_s27 + $0x208] sm:$0xff]  ;;  %v237_v2 = vld [vmem:[%s1465_s27 + $0x210] sm:$0xff]  ;;  %v202_v3 = vld [vmem:[%s1465_s27 + $0xf8] sm:$0xff] }
  0x24   : > { %1345 = vmatmul.mubr.msk.f32.gmra.mxu1 %vm248_vm1, %v214_v21  ;;  %v203_v4 = vld [vmem:[%s1465_s27 + $0x100] sm:$0xff]  ;;  %v238_v5 = vld [vmem:[%s1465_s27 + $0x218] sm:$0xff]  ;;  %v204_v7 = vld [vmem:[%s1465_s27 + $0x108] sm:$0xff] }
  0x25   : > { %1347 = vmatprep.mubr.msk.f32.mxu1 %vm248_vm1, %v215_v22  ;;  %v239_v6 = vld [vmem:[%s1465_s27 + $0x220] sm:$0xff]  ;;  %v205_v8 = vld [vmem:[%s1465_s27 + $0x110] sm:$0xff]  ;;  %v240_v9 = vld [vmem:[%s1465_s27 + $0x228] sm:$0xff] }
  0x26   : > { %1294 = vmatmul.mubr.msk.f32.gmra.mxu0 %vm248_vm1, %v180_v23  ;;  %v241_v10 = vld [vmem:[%s1465_s27 + $0x230] sm:$0xff]  ;;  %v206_v11 = vld [vmem:[%s1465_s27 + $0x118] sm:$0xff] }
  0x27   : > { %1296 = vmatprep.mubr.msk.f32.mxu0 %vm248_vm1, %v181_v24  ;;  %v242_v12 = vld [vmem:[%s1465_s27 + $0x238] sm:$0xff] }
  0x28   : > { %1348 = vmatmul.mubr.msk.f32.gmra.mxu1 %vm248_vm1, %v216_v25 }
  0x29   : > { %1350 = vmatprep.mubr.msk.f32.mxu1 %vm248_vm1, %v217_v26 }
  0x2a   : > { %1297 = vmatmul.mubr.msk.f32.gmra.mxu0 %vm248_vm1, %v182_v27 }
  0x2b   : > { %1299 = vmatprep.mubr.msk.f32.mxu0 %vm248_vm1, %v183_v28 }
  0x2c   : > { %1351 = vmatmul.mubr.msk.f32.gmra.mxu1 %vm248_vm1, %v218_v29 }
  0x2d   : > { %1353 = vmatprep.mubr.msk.f32.mxu1 %vm248_vm1, %v219_v30 }
  0x2e   : > { %1300 = vmatmul.mubr.msk.f32.gmra.mxu0 %vm248_vm1, %v184_v31 }
  0x2f   : > { %1302 = vmatprep.mubr.msk.f32.mxu0 %vm248_vm1, %v185_v32 }
  0x30   : > { %1354 = vmatmul.mubr.msk.f32.gmra.mxu1 %vm248_vm1, %v220_v33 }
  0x31   : > { %1356 = vmatprep.mubr.msk.f32.mxu1 %vm248_vm1, %v221_v34 }
  0x32   : > { %1303 = vmatmul.mubr.msk.f32.gmra.mxu0 %vm248_vm1, %v186_v35 }
  0x33   : > { %1305 = vmatprep.mubr.msk.f32.mxu0 %vm248_vm1, %v187_v36 }
  0x34   : > { %1357 = vmatmul.mubr.msk.f32.gmra.mxu1 %vm248_vm1, %v222_v37 }
  0x35   : > { %1359 = vmatprep.mubr.msk.f32.mxu1 %vm248_vm1, %v223_v38 }
  0x36   : > { %1306 = vmatmul.mubr.msk.f32.gmra.mxu0 %vm248_vm1, %v188_v39 }
  0x37   : > { %1308 = vmatprep.mubr.msk.f32.mxu0 %vm248_vm1, %v189_v40 }
  0x38   : > { %1360 = vmatmul.mubr.msk.f32.gmra.mxu1 %vm248_vm1, %v224_v41 }
  0x39   : > { %1362 = vmatprep.mubr.msk.f32.mxu1 %vm248_vm1, %v225_v42 }
  0x3a   : > { %1309 = vmatmul.mubr.msk.f32.gmra.mxu0 %vm248_vm1, %v190_v43 }
  0x3b   : > { %1311 = vmatprep.mubr.msk.f32.mxu0 %vm248_vm1, %v191_v44 }
  0x3c   : > { %1363 = vmatmul.mubr.msk.f32.gmra.mxu1 %vm248_vm1, %v226_v45 }
  0x3d   : > { %1365 = vmatprep.mubr.msk.f32.mxu1 %vm248_vm1, %v227_v46 }
  0x3e   : > { %1312 = vmatmul.mubr.msk.f32.gmra.mxu0 %vm248_vm1, %v192_v47 }
  0x3f   : > { %1314 = vmatprep.mubr.msk.f32.mxu0 %vm248_vm1, %v193_v48 }
  0x40   : > { %1366 = vmatmul.mubr.msk.f32.gmra.mxu1 %vm248_vm1, %v228_v49 }
  0x41   : > { %1368 = vmatprep.mubr.msk.f32.mxu1 %vm248_vm1, %v229_v50 }
  0x42   : > { %1315 = vmatmul.mubr.msk.f32.gmra.mxu0 %vm248_vm1, %v194_v51 }
  0x43   : > { %1317 = vmatprep.mubr.msk.f32.mxu0 %vm248_vm1, %v195_v52 }
  0x44   : > { %1369 = vmatmul.mubr.msk.f32.gmra.mxu1 %vm248_vm1, %v230_v53 }
  0x45   : > { %1371 = vmatprep.mubr.msk.f32.mxu1 %vm248_vm1, %v231_v54 }
  0x46   : > { %1318 = vmatmul.mubr.msk.f32.gmra.mxu0 %vm248_vm1, %v196_v55 }
  0x47   : > { %1320 = vmatprep.mubr.msk.f32.mxu0 %vm248_vm1, %v197_v56 }
  0x48   : > { %1372 = vmatmul.mubr.msk.f32.gmra.mxu1 %vm248_vm1, %v232_v57 }
  0x49   : > { %1374 = vmatprep.mubr.msk.f32.mxu1 %vm248_vm1, %v233_v58 }
  0x4a   : > { %1321 = vmatmul.mubr.msk.f32.gmra.mxu0 %vm248_vm1, %v198_v59 }
  0x4b   : > { %1323 = vmatprep.mubr.msk.f32.mxu0 %vm248_vm1, %v199_v60 }
  0x4c   : > { %1375 = vmatmul.mubr.msk.f32.gmra.mxu1 %vm248_vm1, %v234_v61 }
  0x4d   : > { %1377 = vmatprep.mubr.msk.f32.mxu1 %vm248_vm1, %v235_v62 }
  0x4e   : > { %1324 = vmatmul.mubr.msk.f32.gmra.mxu0 %vm248_vm1, %v200_v63 }
  0x4f   : > { %1326 = vmatprep.mubr.msk.f32.mxu0 %vm248_vm1, %v201_v0 }
  0x50   : > { %1378 = vmatmul.mubr.msk.f32.gmra.mxu1 %vm248_vm1, %v236_v1 }
  0x51   : > { %1380 = vmatprep.mubr.msk.f32.mxu1 %vm248_vm1, %v237_v2 }
  0x52   : > { %1327 = vmatmul.mubr.msk.f32.gmra.mxu0 %vm248_vm1, %v202_v3 }
  0x53   : > { %1329 = vmatprep.mubr.msk.f32.mxu0 %vm248_vm1, %v203_v4 }
  0x54   : > { %1381 = vmatmul.mubr.msk.f32.gmra.mxu1 %vm248_vm1, %v238_v5 }
  0x55   : > { %1383 = vmatprep.mubr.msk.f32.mxu1 %vm248_vm1, %v239_v6 }
  0x56   : > { %1330 = vmatmul.mubr.msk.f32.gmra.mxu0 %vm248_vm1, %v204_v7 }
  0x57   : > { %1332 = vmatprep.mubr.msk.f32.mxu0 %vm248_vm1, %v205_v8 }
  0x58   : > { %1384 = vmatmul.mubr.msk.f32.gmra.mxu1 %vm248_vm1, %v240_v9 }
  0x59   : > { %1386 = vmatprep.mubr.msk.f32.mxu1 %vm248_vm1, %v241_v10 }
  0x5a   : > { %1333 = vmatmul.mubr.msk.f32.gmra.mxu0 %vm248_vm1, %v206_v11 }
  0x5c   : > { %1387 = vmatmul.mubr.msk.f32.gmra.mxu1 %vm248_vm1, %v242_v12 }
  0xd6   : > { %v1611_v13 = vpop.f32.mrf.mxu0 }
  0xd7   : > { %v895_v56 = vmax.f32 %v1611_v13, 0.0 }
  0xd8   : > { %v1613_v14 = vpop.f32.mrf.mxu0  ;;  %v1615_v15 = vpop.f32.mrf.mxu1 }
  0xd9   : > { %v894_v57 = vmax.f32 %v1613_v14, 0.0  ;;  %v931_v58 = vmax.f32 %v1615_v15, 0.0 }
  0xda   : > { %v1617_v16 = vpop.f32.mrf.mxu0  ;;  %v1619_v17 = vpop.f32.mrf.mxu1 }
  0xdb   : > { %v897_v61 = vmax.f32 %v1617_v16, 0.0  ;;  %v930_v62 = vmax.f32 %v1619_v17, 0.0 }
  0xdc   : > { %v1621_v18 = vpop.f32.mrf.mxu0  ;;  %v1623_v19 = vpop.f32.mrf.mxu1 }
  0xdd   : > { %v896_v63 = vmax.f32 %v1621_v18, 0.0 }
  0xde   : > { %v1625_v20 = vpop.f32.mrf.mxu0  ;;  %v1627_v21 = vpop.f32.mrf.mxu1 }
  0xdf   : > { %v899_v2 = vmax.f32 %v1625_v20, 0.0 }
  0xe0   : > { %v1629_v22 = vpop.f32.mrf.mxu0  ;;  %v1631_v23 = vpop.f32.mrf.mxu1 }
  0xe1   : > { %v898_v7 = vmax.f32 %v1629_v22, 0.0 }
  0xe2   : > { %v1633_v24 = vpop.f32.mrf.mxu0  ;;  %v1635_v25 = vpop.f32.mrf.mxu1 }
  0xe3   : > { %v901_v9 = vmax.f32 %v1633_v24, 0.0 }
  0xe4   : > { %v1637_v26 = vpop.f32.mrf.mxu0  ;;  %v1639_v27 = vpop.f32.mrf.mxu1 }
  0xe5   : > { %v900_v12 = vmax.f32 %v1637_v26, 0.0 }
  0xe6   : > { %v1295_v28 = vpop.f32.mrf.mxu0  ;;  %v1641_v29 = vpop.f32.mrf.mxu1 }
  0xe7   : > { %v903_v0 = vmax.f32 %v1295_v28, 0.0 }
  0xe8   : > { %v575_v30 = vpop.f32.mrf.mxu0  ;;  %v1643_v31 = vpop.f32.mrf.mxu1 }
  0xe9   : > { %v902_v4 = vmax.f32 %v575_v30, 0.0  ;;  %v967_v28 = vmax.f32 %v895_v56, %v903_v0  ;;  %v939_v24 = vmax.f32 %v1643_v31, 0.0 }
  0xea   : > { %v1298_v32 = vpop.f32.mrf.mxu0  ;;  %v1645_v33 = vpop.f32.mrf.mxu1 }
  0xeb   : > { %v905_v10 = vmax.f32 %v1298_v32, 0.0  ;;  %v966_v8 = vmax.f32 %v894_v57, %v902_v4 }
  0xec   : > { %v585_v34 = vpop.f32.mrf.mxu0  ;;  %v1647_v35 = vpop.f32.mrf.mxu1 }
  0xed   : > { %v904_v13 = vmax.f32 %v585_v34, 0.0  ;;  %v969_v11 = vmax.f32 %v897_v61, %v905_v10 }
  0xee   : > { %v1301_v36 = vpop.f32.mrf.mxu0  ;;  %v1649_v37 = vpop.f32.mrf.mxu1 }
  0xef   : > { %v907_v14 = vmax.f32 %v1301_v36, 0.0  ;;  %v968_v22 = vmax.f32 %v896_v63, %v904_v13 }
  0xf0   : > { %v1651_v38 = vpop.f32.mrf.mxu0  ;;  %v1653_v39 = vpop.f32.mrf.mxu1 }
  0xf1   : > { %v906_v30 = vmax.f32 %v1651_v38, 0.0  ;;  %v971_v38 = vmax.f32 %v899_v2, %v907_v14 }
  0xf2   : > { %v1655_v40 = vpop.f32.mrf.mxu0  ;;  %v1657_v41 = vpop.f32.mrf.mxu1 }
  0xf3   : > { %v909_v26 = vmax.f32 %v1655_v40, 0.0  ;;  %v970_v40 = vmax.f32 %v898_v7, %v906_v30 }
  0xf4   : > { %v1659_v42 = vpop.f32.mrf.mxu0  ;;  %v1661_v43 = vpop.f32.mrf.mxu1 }
  0xf5   : > { %v908_v56 = vmax.f32 %v1659_v42, 0.0  ;;  %v973_v3 = vmax.f32 %v901_v9, %v909_v26 }
  0xf6   : > { %v1663_v44 = vpop.f32.mrf.mxu0  ;;  %v1665_v45 = vpop.f32.mrf.mxu1 }
  0xf7   : > { %v911_v0 = vmax.f32 %v1663_v44, 0.0 }
  0xf8   : > { %v1667_v46 = vpop.f32.mrf.mxu0  ;;  %v1669_v47 = vpop.f32.mrf.mxu1 }
  0xf9   : > { %v910_v4 = vmax.f32 %v1667_v46, 0.0  ;;  %v972_v46 = vmax.f32 %v900_v12, %v908_v56  ;;  %v975_v14 = vmax.f32 %v967_v28, %v911_v0 }
  0xfa   : > { %v1671_v48 = vpop.f32.mrf.mxu0  ;;  %v1673_v49 = vpop.f32.mrf.mxu1 }
  0xfb   : > { %v913_v61 = vmax.f32 %v1671_v48, 0.0  ;;  %v974_v32 = vmax.f32 %v966_v8, %v910_v4  ;;  %v947_v48 = vmax.f32 %v1669_v47, 0.0 }
  0xfc   : > { %v1675_v50 = vpop.f32.mrf.mxu0  ;;  %v1677_v51 = vpop.f32.mrf.mxu1 }
  0xfd   : > { %v912_v63 = vmax.f32 %v1675_v50, 0.0  ;;  %v977_v50 = vmax.f32 %v969_v11, %v913_v61  ;;  %v949_v42 = vmax.f32 %v1677_v51, 0.0 }
  0xfe   : > { %v1679_v52 = vpop.f32.mrf.mxu0  ;;  %v1681_v53 = vpop.f32.mrf.mxu1 }
  0xff   : > { %v915_v10 = vmax.f32 %v1679_v52, 0.0  ;;  %v976_v28 = vmax.f32 %v968_v22, %v912_v63 }
 0x100   : > { %v1683_v54 = vpop.f32.mrf.mxu0  ;;  %v1685_v55 = vpop.f32.mrf.mxu1 }
 0x101   : > { %v914_v30 = vmax.f32 %v1683_v54, 0.0  ;;  %v979_v57 = vmax.f32 %v971_v38, %v915_v10 }
 0x102   : > { %v1690_v59 = vpop.f32.mrf.mxu0  ;;  %v1692_v60 = vpop.f32.mrf.mxu1 }
 0x103   : > { %v917_v9 = vmax.f32 %v1690_v59, 0.0  ;;  %v978_v4 = vmax.f32 %v970_v40, %v914_v30  ;;  %v951_v59 = vmax.f32 %v1685_v55, 0.0  ;;  %v950_v61 = vmax.f32 %v1692_v60, 0.0 }
 0x104   : > { %v1700_v5 = vpop.f32.mrf.mxu0  ;;  %v1702_v6 = vpop.f32.mrf.mxu1 }
 0x105   : > { %v916_v54 = vmax.f32 %v1700_v5, 0.0  ;;  %v981_v11 = vmax.f32 %v973_v3, %v917_v9 }
 0x106   : > { %v1709_v16 = vpop.f32.mrf.mxu0  ;;  %v1711_v18 = vpop.f32.mrf.mxu1 }
 0x107   : > { %v919_v8 = vmax.f32 %v1709_v16, 0.0  ;;  %v980_v30 = vmax.f32 %v972_v46, %v916_v54 }
 0x108   : > { %v1719_v34 = vpop.f32.mrf.mxu0  ;;  %v1721_v36 = vpop.f32.mrf.mxu1 }
 0x109   : > { %v918_v38 = vmax.f32 %v1719_v34, 0.0  ;;  %v983_v56 = vmax.f32 %v975_v14, %v919_v8 }
 0x10a   : > { %v1322_v20 = vpop.f32.mrf.mxu0  ;;  %v1728_v1 = vpop.f32.mrf.mxu1 }
 0x10b   : > { %v921_v22 = vmax.f32 %v1322_v20, 0.0  ;;  %v982_v15 = vmax.f32 %v974_v32, %v918_v38  ;;  %v954_v46 = vmax.f32 %v1728_v1, 0.0 }
 0x10c   : > { %v665_v2 = vpop.f32.mrf.mxu0  ;;  %v1736_v13 = vpop.f32.mrf.mxu1 }
 0x10d   : > { %v920_v3 = vmax.f32 %v665_v2, 0.0  ;;  %v957_v14 = vmax.f32 %v1736_v13, 0.0 }
 0x10e   : > { %v1325_v26 = vpop.f32.mrf.mxu0  ;;  %v1743_v44 = vpop.f32.mrf.mxu1 }
 0x10f   : > { %v923_v12 = vmax.f32 %v1325_v26, 0.0  ;;  %v984_v54 = vmax.f32 %v976_v28, %v920_v3  ;;  %v956_v32 = vmax.f32 %v1743_v44, 0.0 }
 0x110   : > { %v675_v47 = vpop.f32.mrf.mxu0  ;;  %v1749_v0 = vpop.f32.mrf.mxu1 }
 0x111   : > { %v987_v7 = vmax.f32 %v979_v57, %v923_v12  ;;  %v922_v52 = vmax.f32 %v675_v47, 0.0  ;;  %v955_v57 = vmax.f32 %v1721_v36, 0.0 }
 0x112   : > { %v1328_v10 = vpop.f32.mrf.mxu0  ;;  %v1754_v63 = vpop.f32.mrf.mxu1 }
 0x113   : > { %v995_v16 = vmax.f32 %v987_v7, %v931_v58  ;;  %v986_v26 = vmax.f32 %v978_v4, %v922_v52  ;;  %v925_v40 = vmax.f32 %v1328_v10, 0.0  ;;  %v985_v58 = vmax.f32 %v977_v50, %v921_v22 }
 0x114   : > { %v685_v9 = vpop.f32.mrf.mxu0  ;;  %v1760_v12 = vpop.f32.mrf.mxu1  ;;  %v1867_v7 = vmax.f32 %v1645_v33, 0.0  ;;  %v959_v50 = vmax.f32 %v1749_v0, 0.0  ;;  %v1869_v4 = vmax.f32 %v1647_v35, 0.0  ;;  %v1870_v33 = vmax.f32 %v1627_v21, 0.0 }
 0x115   : > { %v1003_v20 = vmax.f32 %v995_v16, %v939_v24  ;;  %v994_v34 = vmax.f32 %v986_v26, %v930_v62  ;;  %v989_v47 = vmax.f32 %v981_v11, %v925_v40  ;;  %v924_v5 = vmax.f32 %v685_v9, 0.0 }
 0x116   : > { %v1331_v36 = vpop.f32.mrf.mxu0  ;;  %v1768_v2 = vpop.f32.mrf.mxu1  ;;  %v1868_v24 = vmax.f32 %v1623_v19, 0.0  ;;  %v958_v19 = vmax.f32 %v1754_v63, 0.0  ;;  %v1871_v0 = vmax.f32 %v1673_v49, 0.0  ;;  %v1873_v35 = vmax.f32 %v1631_v23, 0.0 }
 0x117   : > { %v1002_v31 = vmax.f32 %v994_v34, %v1867_v7  ;;  %v988_v62 = vmax.f32 %v980_v30, %v924_v5  ;;  %v927_v52 = vmax.f32 %v1331_v36, 0.0  ;;  %v1011_v13 = vmax.f32 %v1003_v20, %v947_v48 }
 0x118   : > { %v997_v17 = vmax.f32 %v989_v47, %v1868_v24  ;;  %v695_v1 = vpop.f32.mrf.mxu0  ;;  %v1385_v8 = vpop.f32.mrf.mxu1  ;;  %v1872_v48 = vmax.f32 %v1649_v37, 0.0  ;;  %v1874_v23 = vmax.f32 %v1653_v39, 0.0  ;;  %v1875_v47 = vmax.f32 %v1635_v25, 0.0 }
 0x119   : > { %v996_v38 = vmax.f32 %v988_v62, %v1870_v33  ;;  %v991_v22 = vmax.f32 %v983_v56, %v927_v52  ;;  %v926_v10 = vmax.f32 %v695_v1, 0.0  ;;  %v963_v5 = vmax.f32 %v1385_v8, 0.0  ;;  %v1035_v56 = vld [vmem:[%s1865_s2 + $0x28] sm:$0xff]  ;;  %v1037_v8 = vld [vmem:[%s1865_s2 + $0x38] sm:$0xff] }
 0x11a   : > { %v1005_v11 = vmax.f32 %v997_v17, %v1869_v4  ;;  %v1019_v28 = vmax.f32 %v1011_v13, %v955_v57  ;;  %v1334_v16 = vpop.f32.mrf.mxu0  ;;  %v875_v44 = vpop.f32.mrf.mxu1  ;;  %v1010_v26 = vmax.f32 %v1002_v31, %v1871_v0  ;;  %v1876_v39 = vmax.f32 %v1657_v41, 0.0 }
 0x11b   : > { %v1004_v40 = vmax.f32 %v996_v38, %v1872_v48  ;;  %v999_v30 = vmax.f32 %v991_v22, %v1873_v35  ;;  %v990_v21 = vmax.f32 %v982_v15, %v926_v10  ;;  %v929_v63 = vmax.f32 %v1334_v16, 0.0 }
 0x11c   : > { %v1027_v3 = vmax.f32 %v1019_v28, %v963_v5  ;;  %v962_v9 = vmax.f32 %v875_v44, 0.0  ;;  %v1018_v57 = vmax.f32 %v1010_v26, %v954_v46  ;;  %v705_v20 = vpop.f32.mrf.mxu0  ;;  %v1388_v34 = vpop.f32.mrf.mxu1  ;;  %v1013_v49 = vmax.f32 %v1005_v11, %v949_v42  ;;  %v1034_v46 = vld [vmem:[%s1865_s2 + $0x20] sm:$0xff]  ;;  %v1033_v44 = vld [vmem:[%s1865_s2 + $0x18] sm:$0xff]  ;;  %v1032_v26 = vld [vmem:[%s1865_s2 + $0x10] sm:$0xff] }
 0x11d   : > { %v1007_v37 = vmax.f32 %v999_v30, %v1874_v23  ;;  %v998_v15 = vmax.f32 %v990_v21, %v1875_v47  ;;  %v993_v36 = vmax.f32 %v985_v58, %v929_v63  ;;  %v928_v7 = vmax.f32 %v705_v20, 0.0 }
 0x11e   : > { %v1043_v51 = vadd.f32 %v1035_v56, %v1027_v3  ;;  %v1026_v42 = vmax.f32 %v1018_v57, %v962_v9  ;;  %v965_v31 = vmax.f32 %v1388_v34, 0.0  ;;  %v1021_v24 = vmax.f32 %v1013_v49, %v957_v14  ;;  %v885_v17 = vpop.f32.mrf.mxu1  ;;  %v1031_v14 = vld [vmem:[%s1865_s2 + $0x8] sm:$0xff] }
 0x11f   : > { %v1015_v62 = vmax.f32 %v1007_v37, %v951_v59  ;;  %v1006_v52 = vmax.f32 %v998_v15, %v1876_v39  ;;  %v1877_v25 = vmax.f32 %v1639_v27, 0.0  ;;  %v992_v58 = vmax.f32 %v984_v54, %v928_v7 }
 0x120   : > { %1052 = vst.msk [vmem:[%s1796_s6 + $0x28] sm:$0xff] %vm1046_vm2, %v1043_v51  ;;  %v1042_v55 = vadd.f32 %v1034_v46, %v1026_v42  ;;  %v1029_v59 = vmax.f32 %v1021_v24, %v965_v31  ;;  %v964_v13 = vmax.f32 %v885_v17, 0.0  ;;  %v1878_v41 = vmax.f32 %v1681_v53, 0.0  ;;  %v1030_v53 = vld [vmem:[%s1865_s2] sm:$0xff] }
 0x121   : > { %v1001_v1 = vmax.f32 %v993_v36, %v1877_v25  ;;  %v1023_v27 = vmax.f32 %v1015_v62, %v959_v50  ;;  %v1014_v54 = vmax.f32 %v1006_v52, %v950_v61  ;;  %v1879_v11 = vmax.f32 %v1661_v43, 0.0 }
 0x122   : > { %v1012_v4 = vmax.f32 %v1004_v40, %v1878_v41  ;;  %v1880_v38 = vmax.f32 %v1641_v29, 0.0  ;;  %v952_v10 = vmax.f32 %v1711_v18, 0.0  ;;  %v961_v5 = vmax.f32 %v1760_v12, 0.0  ;;  %1051 = vst.msk [vmem:[%s1796_s6 + $0x20] sm:$0xff] %vm1046_vm2, %v1042_v55  ;;  %v1036_v12 = vld [vmem:[%s1865_s2 + $0x30] sm:$0xff] }
 0x123   : > { %v1009_v33 = vmax.f32 %v1001_v1, %v1879_v11  ;;  %v1045_v60 = vadd.f32 %v1037_v8, %v1029_v59  ;;  %v1039_v61 = vadd.f32 %v1031_v14, %v1023_v27  ;;  %v1022_v43 = vmax.f32 %v1014_v54, %v958_v19 }
 0x124   : > { %v1000_v22 = vmax.f32 %v992_v58, %v1880_v38  ;;  %v1020_v50 = vmax.f32 %v1012_v4, %v956_v32  ;;  %v1881_v28 = vmax.f32 %v1702_v6, 0.0  ;;  %v1882_v16 = vmax.f32 %v1665_v45, 0.0 }
 0x125   : > { %1054 = vst.msk [vmem:[%s1796_s6 + $0x38] sm:$0xff] %vm1046_vm2, %v1045_v60  ;;  %1048 = vst.msk [vmem:[%s1796_s6 + $0x8] sm:$0xff] %vm1046_vm2, %v1039_v61  ;;  %v960_v6 = vmax.f32 %v1768_v2, 0.0  ;;  %v1038_v45 = vadd.f32 %v1030_v53, %v1022_v43 }
 0x126   : > { %v1017_v29 = vmax.f32 %v1009_v33, %v1881_v28  ;;  %v1008_v18 = vmax.f32 %v1000_v22, %v1882_v16  ;;  %v1028_v32 = vmax.f32 %v1020_v50, %v964_v13 }
 0x127   : > { %1047 = vst.msk [vmem:[%s1796_s6] sm:$0xff] %vm1046_vm2, %v1038_v45 }
 0x128   : > { %v1025_v19 = vmax.f32 %v1017_v29, %v961_v5  ;;  %v1016_v0 = vmax.f32 %v1008_v18, %v952_v10  ;;  %v1044_v48 = vadd.f32 %v1036_v12, %v1028_v32 }
 0x12a   : > { %v1041_v40 = vadd.f32 %v1033_v44, %v1025_v19  ;;  %v1024_v35 = vmax.f32 %v1016_v0, %v960_v6  ;;  %1053 = vst.msk [vmem:[%s1796_s6 + $0x30] sm:$0xff] %vm1046_vm2, %v1044_v48 }
 0x12c   : > { %1050 = vst.msk [vmem:[%s1796_s6 + $0x18] sm:$0xff] %vm1046_vm2, %v1041_v40  ;;  %v1040_v30 = vadd.f32 %v1032_v26, %v1024_v35 }
 0x12e   : > { %1049 = vst.msk [vmem:[%s1796_s6 + $0x10] sm:$0xff] %vm1046_vm2, %v1040_v30 }
 0x12f PF: > { %s13_s12 = sadd.s32 1, %s1414_s12  }
 0x130   : > { %p10_p4 = scmp.ge.s32.totalorder %s13_s12, 4  }
 0x132   :  { %12 = sbr.rel (!%p10_p4) target bundleno = 1 (0x1), region = 62 }

// kernel: cct_forward.6
= control target key start
LH: loop header
LB: loop body
LE: loop exit
PB: predicated region body
PF: predicated region fallthrough
CT: control target
= control target key end

     0   :  { %s635_s12 = smov 0   ;;  %s812_s0 = inlined_call_operand.vmem [shape: f32[2,144,144], index: 0, kind: input, shape index: {}]   ;;  %s813_s1 = inlined_call_operand.vmem [shape: f32[144,32], index: 1, kind: input, shape index: {}]   ;;  %s814_s2 = inlined_call_operand.vmem [shape: f32[1,16,32], index: 2, kind: input, shape index: {}]   ;;  %s815_s3 = inlined_call_operand.vmem [shape: f32[2,16,32], index: 3, kind: output, shape index: {}]  }
   0x1 LB: > { %s531_s13 = sadd.s32 4294967295, %s612_s12   ;;  %p535_p0 = scmp.ge.s32.totalorder %s612_s12, 1  ;;  %s612_s12 = sphi %s635_s12, %s13_s12  }
   0x2   : > { %p137_p1 = scmp.lt.s32.totalorder %s612_s12, 3 }
   0x4   : > { %p138_p2 = pnand %p535_p0, %p137_p1 }
   0x5   : > { %p161_p3 = scmp.lt.s32.totalorder (!%p138_p2), %s531_s13, 1 }
   0x6   : > { %141 = sbr.rel (%p138_p2) target bundleno = 288 (0x120), region = 32 }
   0xb   : > { %v222_v0 = vld [vmem:[%s813_s1 + $0x78] sm:$0xff]  ;;  %v614_v1 = vmov 0.0   ;;  %v221_v2 = vld [vmem:[%s813_s1 + $0x70] sm:$0xff]  ;;  %v220_v3 = vld [vmem:[%s813_s1 + $0x68] sm:$0xff]  ;;  %s817_s13 = smov (!%p161_p3, %s531_s13), 1  ;;  %vm225_vm0 = vcmask 130048  }
   0xc   : > { %280 = vmatprep.subr.mxu0 %v614_v1  ;;  %560 = vmatprep.subr.mxu1 %v614_v1  ;;  %v219_v4 = vld [vmem:[%s813_s1 + $0x60] sm:$0xff]  ;;  %v218_v5 = vld [vmem:[%s813_s1 + $0x58] sm:$0xff]  ;;  %v217_v6 = vld [vmem:[%s813_s1 + $0x50] sm:$0xff]  ;;  %s596_s11 = smul.u32 288, %s817_s13  ;;  %s559_s29 = sshll.u32 %s817_s13, 4  ;;  %vm473_vm1 = vcmask 261120  }
   0xd   : > { %281 = vmatpush1.msra.mxu0 %v222_v0  ;;  %578 = vmatpush1.msra.mxu1 %v222_v0  ;;  %v216_v7 = vld [vmem:[%s813_s1 + $0x48] sm:$0xff]  ;;  %v215_v8 = vld [vmem:[%s813_s1 + $0x40] sm:$0xff]  ;;  %v214_v9 = vld [vmem:[%s813_s1 + $0x38] sm:$0xff]  ;;  %s170_s7 = scalar_lea.vmem %s815_s3, %s559_s29 }
   0xe   : > { %282 = vmatprep.subr.mxu0 %v614_v1  ;;  %561 = vmatprep.subr.mxu1 %v614_v1  ;;  %v213_v10 = vld [vmem:[%s813_s1 + $0x30] sm:$0xff]  ;;  %v212_v11 = vld [vmem:[%s813_s1 + $0x28] sm:$0xff]  ;;  %v211_v12 = vld [vmem:[%s813_s1 + $0x20] sm:$0xff]  ;;  %s721_s20 = scalar_lea.vmem %s812_s0, %s596_s11 }
   0xf   : > { %283 = vmatpush1.msra.mxu0 %v221_v2  ;;  %579 = vmatpush1.msra.mxu1 %v221_v2  ;;  %v210_v13 = vld [vmem:[%s813_s1 + $0x18] sm:$0xff]  ;;  %v209_v14 = vld [vmem:[%s813_s1 + $0x10] sm:$0xff]  ;;  %v208_v15 = vld [vmem:[%s813_s1 + $0x8] sm:$0xff] }
  0x10   : > { %284 = vmatprep.subr.mxu0 %v614_v1  ;;  %562 = vmatprep.subr.mxu1 %v614_v1  ;;  %v172_v16 = vld [vmem:[%s721_s20 + $0x8] sm:$0xff]  ;;  %v207_v17 = vld [vmem:[%s813_s1] sm:$0xff]  ;;  %v174_v21 = vld [vmem:[%s721_s20 + $0x18] sm:$0xff] }
  0x11   : > { %285 = vmatpush1.msra.mxu0 %v220_v3  ;;  %580 = vmatpush1.msra.mxu1 %v220_v3  ;;  %v224_v18 = vld [vmem:[%s813_s1 + $0x88] sm:$0xff]  ;;  %v223_v19 = vld [vmem:[%s813_s1 + $0x80] sm:$0xff]  ;;  %v190_v22 = vld [vmem:[%s721_s20 + $0x98] sm:$0xff] }
  0x12   : > { %286 = vmatprep.subr.mxu0 %v614_v1  ;;  %563 = vmatprep.subr.mxu1 %v614_v1  ;;  %v171_v20 = vld [vmem:[%s721_s20] sm:$0xff]  ;;  %v189_v23 = vld [vmem:[%s721_s20 + $0x90] sm:$0xff]  ;;  %v192_v24 = vld [vmem:[%s721_s20 + $0xa8] sm:$0xff] }
  0x13   : > { %287 = vmatpush1.msra.mxu0 %v219_v4  ;;  %581 = vmatpush1.msra.mxu1 %v219_v4  ;;  %v173_v25 = vld [vmem:[%s721_s20 + $0x10] sm:$0xff]  ;;  %v176_v26 = vld [vmem:[%s721_s20 + $0x28] sm:$0xff]  ;;  %v191_v27 = vld [vmem:[%s721_s20 + $0xa0] sm:$0xff] }
  0x14   : > { %288 = vmatprep.subr.mxu0 %v614_v1  ;;  %564 = vmatprep.subr.mxu1 %v614_v1  ;;  %v194_v28 = vld [vmem:[%s721_s20 + $0xb8] sm:$0xff]  ;;  %v175_v29 = vld [vmem:[%s721_s20 + $0x20] sm:$0xff]  ;;  %v193_v31 = vld [vmem:[%s721_s20 + $0xb0] sm:$0xff] }
  0x15   : > { %289 = vmatpush1.msra.mxu0 %v218_v5  ;;  %582 = vmatpush1.msra.mxu1 %v218_v5  ;;  %v178_v30 = vld [vmem:[%s721_s20 + $0x38] sm:$0xff]  ;;  %v196_v32 = vld [vmem:[%s721_s20 + $0xc8] sm:$0xff]  ;;  %v177_v33 = vld [vmem:[%s721_s20 + $0x30] sm:$0xff] }
  0x16   : > { %290 = vmatprep.subr.mxu0 %v614_v1  ;;  %565 = vmatprep.subr.mxu1 %v614_v1  ;;  %v180_v34 = vld [vmem:[%s721_s20 + $0x48] sm:$0xff]  ;;  %v195_v35 = vld [vmem:[%s721_s20 + $0xc0] sm:$0xff]  ;;  %v198_v36 = vld [vmem:[%s721_s20 + $0xd8] sm:$0xff] }
  0x17   : > { %291 = vmatpush1.msra.mxu0 %v217_v6  ;;  %583 = vmatpush1.msra.mxu1 %v217_v6  ;;  %v179_v37 = vld [vmem:[%s721_s20 + $0x40] sm:$0xff]  ;;  %v182_v38 = vld [vmem:[%s721_s20 + $0x58] sm:$0xff]  ;;  %v197_v39 = vld [vmem:[%s721_s20 + $0xd0] sm:$0xff] }
  0x18   : > { %292 = vmatprep.subr.mxu0 %v614_v1  ;;  %566 = vmatprep.subr.mxu1 %v614_v1  ;;  %v200_v40 = vld [vmem:[%s721_s20 + $0xe8] sm:$0xff]  ;;  %v181_v41 = vld [vmem:[%s721_s20 + $0x50] sm:$0xff]  ;;  %v199_v43 = vld [vmem:[%s721_s20 + $0xe0] sm:$0xff] }
  0x19   : > { %293 = vmatpush1.msra.mxu0 %v216_v7  ;;  %584 = vmatpush1.msra.mxu1 %v216_v7  ;;  %v184_v42 = vld [vmem:[%s721_s20 + $0x68] sm:$0xff]  ;;  %v202_v44 = vld [vmem:[%s721_s20 + $0xf8] sm:$0xff]  ;;  %v183_v45 = vld [vmem:[%s721_s20 + $0x60] sm:$0xff] }
  0x1a   : > { %294 = vmatprep.subr.mxu0 %v614_v1  ;;  %567 = vmatprep.subr.mxu1 %v614_v1  ;;  %v186_v46 = vld [vmem:[%s721_s20 + $0x78] sm:$0xff]  ;;  %v201_v47 = vld [vmem:[%s721_s20 + $0xf0] sm:$0xff]  ;;  %v204_v48 = vld [vmem:[%s721_s20 + $0x108] sm:$0xff] }
  0x1b   : > { %295 = vmatpush1.msra.mxu0 %v215_v8  ;;  %585 = vmatpush1.msra.mxu1 %v215_v8  ;;  %v185_v49 = vld [vmem:[%s721_s20 + $0x70] sm:$0xff]  ;;  %v188_v50 = vld [vmem:[%s721_s20 + $0x88] sm:$0xff]  ;;  %v203_v51 = vld [vmem:[%s721_s20 + $0x100] sm:$0xff] }
  0x1c   : > { %296 = vmatprep.subr.mxu0 %v614_v1  ;;  %568 = vmatprep.subr.mxu1 %v614_v1  ;;  %v206_v52 = vld [vmem:[%s721_s20 + $0x118] sm:$0xff]  ;;  %v187_v53 = vld [vmem:[%s721_s20 + $0x80] sm:$0xff]  ;;  %v205_v54 = vld [vmem:[%s721_s20 + $0x110] sm:$0xff] }
  0x1d   : > { %297 = vmatpush1.msra.mxu0 %v214_v9  ;;  %586 = vmatpush1.msra.mxu1 %v214_v9 }
  0x1e   : > { %298 = vmatprep.subr.mxu0 %v614_v1  ;;  %569 = vmatprep.subr.mxu1 %v614_v1 }
  0x1f   : > { %299 = vmatpush1.msra.mxu0 %v213_v10  ;;  %587 = vmatpush1.msra.mxu1 %v213_v10 }
  0x20   : > { %300 = vmatprep.subr.mxu0 %v614_v1  ;;  %570 = vmatprep.subr.mxu1 %v614_v1 }
  0x21   : > { %301 = vmatpush1.msra.mxu0 %v212_v11  ;;  %588 = vmatpush1.msra.mxu1 %v212_v11 }
  0x22   : > { %302 = vmatprep.subr.mxu0 %v614_v1  ;;  %571 = vmatprep.subr.mxu1 %v614_v1 }
  0x23   : > { %303 = vmatpush1.msra.mxu0 %v211_v12  ;;  %589 = vmatpush1.msra.mxu1 %v211_v12 }
  0x24   : > { %304 = vmatprep.subr.mxu0 %v614_v1  ;;  %572 = vmatprep.subr.mxu1 %v614_v1 }
  0x25   : > { %305 = vmatpush1.msra.mxu0 %v210_v13  ;;  %590 = vmatpush1.msra.mxu1 %v210_v13 }
  0x26   : > { %306 = vmatprep.subr.mxu0 %v614_v1  ;;  %573 = vmatprep.subr.mxu1 %v614_v1 }
  0x27   : > { %307 = vmatpush1.msra.mxu0 %v209_v14  ;;  %591 = vmatpush1.msra.mxu1 %v209_v14 }
  0x28   : > { %308 = vmatprep.subr.mxu0 %v614_v1  ;;  %574 = vmatprep.subr.mxu1 %v614_v1 }
  0x29   : > { %309 = vmatpush1.msra.mxu0 %v208_v15  ;;  %592 = vmatpush1.msra.mxu1 %v208_v15 }
  0x2a   : > { %310 = vmatprep.subr.mxu0 %v614_v1  ;;  %539 = vmatprep.mubr.msk.f32.mxu0 %vm225_vm0, %v172_v16 }
  0x2b   : > { %311 = vmatpush1.msra.mxu0 %v207_v17  ;;  %575 = vmatprep.subr.mxu1 %v614_v1 }
  0x2c   : > { %340 = vmatprep.subr.mxu0 %v614_v1  ;;  %593 = vmatpush1.msra.mxu1 %v207_v17 }
  0x2d   : > { %341 = vmatpush2.msra.mxu0 %v224_v18  ;;  %576 = vmatprep.subr.mxu1 %v614_v1 }
  0x2e   : > { %342 = vmatprep.subr.mxu0 %v614_v1  ;;  %594 = vmatpush2.msra.mxu1 %v224_v18 }
  0x2f   : > { %343 = vmatpush2.msra.mxu0 %v223_v19  ;;  %577 = vmatprep.subr.mxu1 %v614_v1 }
  0x30   : > { %345 = vmatmul.mubr.f32.vlgmr.msra.gmra.mxu0 %v171_v20  ;;  %595 = vmatpush2.msra.mxu1 %v223_v19 }
  0x31   : > { %540 = vmatprep.mubr.msk.f32.mxu0 %vm225_vm0, %v174_v21  ;;  %548 = vmatprep.mubr.msk.f32.mxu1 %vm225_vm0, %v190_v22 }
  0x32   : > { %390 = vmatmul.mubr.f32.vlgmr.msra.gmra.mxu1 %v189_v23 }
  0x33   : > { %549 = vmatprep.mubr.msk.f32.mxu1 %vm225_vm0, %v192_v24 }
  0x34   : > { %350 = vmatmul.mubr.f32.gmra.mxu0 %v173_v25 }
  0x35   : > { %541 = vmatprep.mubr.msk.f32.mxu0 %vm225_vm0, %v176_v26 }
  0x36   : > { %395 = vmatmul.mubr.f32.gmra.mxu1 %v191_v27 }
  0x37   : > { %550 = vmatprep.mubr.msk.f32.mxu1 %vm225_vm0, %v194_v28 }
  0x38   : > { %355 = vmatmul.mubr.f32.gmra.mxu0 %v175_v29 }
  0x39   : > { %542 = vmatprep.mubr.msk.f32.mxu0 %vm225_vm0, %v178_v30 }
  0x3a   : > { %400 = vmatmul.mubr.f32.gmra.mxu1 %v193_v31 }
  0x3b   : > { %551 = vmatprep.mubr.msk.f32.mxu1 %vm225_vm0, %v196_v32 }
  0x3c   : > { %360 = vmatmul.mubr.f32.gmra.mxu0 %v177_v33 }
  0x3d   : > { %543 = vmatprep.mubr.msk.f32.mxu0 %vm225_vm0, %v180_v34 }
  0x3e   : > { %405 = vmatmul.mubr.f32.gmra.mxu1 %v195_v35 }
  0x3f   : > { %552 = vmatprep.mubr.msk.f32.mxu1 %vm225_vm0, %v198_v36 }
  0x40   : > { %365 = vmatmul.mubr.f32.gmra.mxu0 %v179_v37 }
  0x41   : > { %544 = vmatprep.mubr.msk.f32.mxu0 %vm225_vm0, %v182_v38 }
  0x42   : > { %410 = vmatmul.mubr.f32.gmra.mxu1 %v197_v39 }
  0x43   : > { %553 = vmatprep.mubr.msk.f32.mxu1 %vm225_vm0, %v200_v40 }
  0x44   : > { %370 = vmatmul.mubr.f32.gmra.mxu0 %v181_v41 }
  0x45   : > { %545 = vmatprep.mubr.msk.f32.mxu0 %vm225_vm0, %v184_v42 }
  0x46   : > { %415 = vmatmul.mubr.f32.gmra.mxu1 %v199_v43 }
  0x47   : > { %554 = vmatprep.mubr.msk.f32.mxu1 %vm225_vm0, %v202_v44 }
  0x48   : > { %375 = vmatmul.mubr.f32.gmra.mxu0 %v183_v45 }
  0x49   : > { %546 = vmatprep.mubr.msk.f32.mxu0 %vm225_vm0, %v186_v46 }
  0x4a   : > { %420 = vmatmul.mubr.f32.gmra.mxu1 %v201_v47 }
  0x4b   : > { %555 = vmatprep.mubr.msk.f32.mxu1 %vm225_vm0, %v204_v48 }
  0x4c   : > { %380 = vmatmul.mubr.f32.gmra.mxu0 %v185_v49 }
  0x4d   : > { %547 = vmatprep.mubr.msk.f32.mxu0 %vm225_vm0, %v188_v50 }
  0x4e   : > { %425 = vmatmul.mubr.f32.gmra.mxu1 %v203_v51 }
  0x4f   : > { %556 = vmatprep.mubr.msk.f32.mxu1 %vm225_vm0, %v206_v52 }
  0x50   : > { %385 = vmatmul.mubr.f32.gmra.mxu0 %v187_v53 }
  0x52   : > { %430 = vmatmul.mubr.f32.gmra.mxu1 %v205_v54 }
  0xf0   : > { %v346_v55 = vpop.f32.mrf.mxu0 }
  0xf1   : > { %v435_v22 = vmax.f32 %v346_v55, 0.0 }
  0xf2   : > { %v348_v56 = vpop.f32.mrf.mxu0  ;;  %v391_v57 = vpop.f32.mrf.mxu1 }
  0xf3   : > { %v444_v33 = vmax.f32 %v391_v57, 0.0  ;;  %v470_v57 = vld [vmem:[%s814_s2 + $0x8] sm:$0xff] }
  0xf4   : > { %v351_v58 = vpop.f32.mrf.mxu0  ;;  %v393_v59 = vpop.f32.mrf.mxu1 }
  0xf5   : > { %v436_v17 = vmax.f32 %v351_v58, 0.0 }
  0xf6   : > { %v353_v60 = vpop.f32.mrf.mxu0  ;;  %v396_v61 = vpop.f32.mrf.mxu1 }
  0xf7   : > { %v445_v44 = vmax.f32 %v396_v61, 0.0  ;;  %v469_v61 = vld [vmem:[%s814_s2] sm:$0xff] }
  0xf8   : > { %v356_v62 = vpop.f32.mrf.mxu0  ;;  %v398_v63 = vpop.f32.mrf.mxu1 }
  0xf9   : > { %v437_v18 = vmax.f32 %v356_v62, 0.0 }
  0xfa   : > { %v358_v0 = vpop.f32.mrf.mxu0  ;;  %v401_v1 = vpop.f32.mrf.mxu1 }
  0xfb   : > { %v453_v27 = vmax.f32 %v435_v22, %v437_v18  ;;  %v446_v38 = vmax.f32 %v401_v1, 0.0 }
  0xfc   : > { %v361_v2 = vpop.f32.mrf.mxu0  ;;  %v403_v3 = vpop.f32.mrf.mxu1 }
  0xfd   : > { %v438_v14 = vmax.f32 %v361_v2, 0.0 }
  0xfe   : > { %v363_v4 = vpop.f32.mrf.mxu0  ;;  %v406_v5 = vpop.f32.mrf.mxu1 }
  0xff   : > { %v454_v23 = vmax.f32 %v436_v17, %v438_v14  ;;  %v447_v48 = vmax.f32 %v406_v5, 0.0 }
 0x100   : > { %v366_v6 = vpop.f32.mrf.mxu0  ;;  %v408_v7 = vpop.f32.mrf.mxu1 }
 0x101   : > { %v439_v24 = vmax.f32 %v366_v6, 0.0 }
 0x102   : > { %v368_v8 = vpop.f32.mrf.mxu0  ;;  %v411_v9 = vpop.f32.mrf.mxu1 }
 0x103   : > { %v455_v34 = vmax.f32 %v453_v27, %v439_v24  ;;  %v448_v45 = vmax.f32 %v411_v9, 0.0 }
 0x104   : > { %v371_v10 = vpop.f32.mrf.mxu0  ;;  %v413_v11 = vpop.f32.mrf.mxu1 }
 0x105   : > { %v440_v19 = vmax.f32 %v371_v10, 0.0 }
 0x106   : > { %v373_v12 = vpop.f32.mrf.mxu0  ;;  %v416_v13 = vpop.f32.mrf.mxu1 }
 0x107   : > { %v456_v28 = vmax.f32 %v454_v23, %v440_v19  ;;  %v449_v54 = vmax.f32 %v416_v13, 0.0 }
 0x108   : > { %v376_v15 = vpop.f32.mrf.mxu0  ;;  %v418_v16 = vpop.f32.mrf.mxu1 }
 0x109   : > { %v441_v29 = vmax.f32 %v376_v15, 0.0 }
 0x10a   : > { %v378_v20 = vpop.f32.mrf.mxu0  ;;  %v421_v21 = vpop.f32.mrf.mxu1 }
 0x10b   : > { %v457_v39 = vmax.f32 %v455_v34, %v441_v29  ;;  %v450_v50 = vmax.f32 %v421_v21, 0.0 }
 0x10c   : > { %v381_v25 = vpop.f32.mrf.mxu0  ;;  %v423_v26 = vpop.f32.mrf.mxu1 }
 0x10d   : > { %v442_v30 = vmax.f32 %v381_v25, 0.0 }
 0x10e   : > { %v383_v31 = vpop.f32.mrf.mxu0  ;;  %v426_v32 = vpop.f32.mrf.mxu1 }
 0x10f   : > { %v458_v35 = vmax.f32 %v456_v28, %v442_v30  ;;  %v451_v58 = vmax.f32 %v426_v32, 0.0 }
 0x110   : > { %v386_v36 = vpop.f32.mrf.mxu0  ;;  %v428_v37 = vpop.f32.mrf.mxu1 }
 0x111   : > { %v460_v40 = vmax.f32 %v458_v35, %v444_v33  ;;  %v443_v41 = vmax.f32 %v386_v36, 0.0 }
 0x112   : > { %v388_v42 = vpop.f32.mrf.mxu0  ;;  %v431_v43 = vpop.f32.mrf.mxu1 }
 0x113   : > { %v462_v46 = vmax.f32 %v460_v40, %v446_v38  ;;  %v459_v47 = vmax.f32 %v457_v39, %v443_v41  ;;  %v452_v53 = vmax.f32 %v431_v43, 0.0 }
 0x114   : > { %v433_v49 = vpop.f32.mrf.mxu1 }
 0x115   : > { %v464_v51 = vmax.f32 %v462_v46, %v448_v45  ;;  %v461_v52 = vmax.f32 %v459_v47, %v445_v44 }
 0x117   : > { %v466_v55 = vmax.f32 %v464_v51, %v450_v50  ;;  %v463_v56 = vmax.f32 %v461_v52, %v447_v48 }
 0x119   : > { %v465_v59 = vmax.f32 %v463_v56, %v449_v54  ;;  %v468_v60 = vmax.f32 %v466_v55, %v452_v53 }
 0x11b   : > { %v467_v62 = vmax.f32 %v465_v59, %v451_v58  ;;  %v472_v63 = vadd.f32 %v470_v57, %v468_v60 }
 0x11d   : > { %v471_v0 = vadd.f32 %v469_v61, %v467_v62  ;;  %475 = vst.msk [vmem:[%s170_s7 + $0x8] sm:$0xff] %vm473_vm1, %v472_v63 }
 0x11f   : > { %474 = vst.msk [vmem:[%s170_s7] sm:$0xff] %vm473_vm1, %v471_v0 }
 0x120 PF: > { %s13_s12 = sadd.s32 1, %s612_s12  }
 0x121   : > { %p10_p4 = scmp.ge.s32.totalorder %s13_s12, 4  }
 0x123   :  { %12 = sbr.rel (!%p10_p4) target bundleno = 1 (0x1), region = 62 }

// kernel: cct_forward.9
= control target key start
LH: loop header
LB: loop body
LE: loop exit
PB: predicated region body
PF: predicated region fallthrough
CT: control target
= control target key end

     0   :  { %s970_s0 = inlined_call_operand.vmem [shape: f32[2,16,32], index: 0, kind: input, shape index: {}]   ;;  %s971_s1 = inlined_call_operand.vmem [shape: f32[1,32], index: 1, kind: input, shape index: {}]   ;;  %s972_s2 = inlined_call_operand.vmem [shape: f32[1,32], index: 2, kind: input, shape index: {}]   ;;  %s973_s3 = inlined_call_operand.vmem [shape: f32[32,1], index: 3, kind: input, shape index: {}]   ;;  %s974_s4 = inlined_call_operand.<no memory space> [shape: f32[1,1], index: 4, kind: input, shape index: {}]   ;;  %s975_s5 = inlined_call_operand.vmem [shape: f32[32,10], index: 5, kind: input, shape index: {}]   ;;  %s976_s6 = inlined_call_operand.vmem [shape: f32[1,10], index: 6, kind: input, shape index: {}]   ;;  %s977_s7 = inlined_call_operand.hbm [shape: f32[2,1,10], index: 7, kind: output, shape index: {}]  }
   0x1   :  { %v12_v0 = vstv %s974_s4 }
   0x2   :  { %13 = vst [vmem:[#allocation2] sm:$0x1] %v12_v0 }
   0x3   :  { %14 = vsyncpa [#allocation4], 0 }
   0x4   :  { %16 = vsyncpa [#allocation4 + $0x1], 0  ;;  %s827_s26 = smov 0   ;;  %s829_s27 = smov 0  }
   0x5   :  { %s831_s28 = smov 0   ;;  %s833_s29 = smov 0  }
   0x6 LB: > { %s848_s4 = sadd.s32 4294967295, %s778_s29   ;;  %s615_s30 = sadd.s32 4294967294, %s778_s29   ;;  %s778_s29 = sphi %s833_s29, %s983_s29   ;;  %s774_s28 = sphi %s831_s28, %s982_s28   ;;  %s770_s27 = sphi %s829_s27, %s981_s27   ;;  %s766_s26 = sphi %s827_s26, %s980_s26  }
   0x7   : > { %s852_s8 = sadd.s32 1, %s778_s29   ;;  %s181_s9 = sadd.s32 1, %s774_s28 }
   0x8   : > { %s178_s10 = ssub.s32 %s778_s29, %s852_s8  ;;  %p191_p0 = scmp.ne.s32.totalorder %s774_s28, %s770_s27 }
   0x9   : > { %p179_p1 = scmp.eq.s32.totalorder %s178_s10, 0  ;;  %p192_p2 = scmp.eq.s32.totalorder %s848_s4, 1 }
   0xa   : > { %p197_p3 = scmp.ne.s32.totalorder %s770_s27, %s766_s26  ;;  %p198_p4 = scmp.eq.s32.totalorder %s615_s30, 1 }
   0xb   : > { %s863_s11 = scalar_select %p179_p1, %s774_s28, %s181_s9  }
   0xc   : > { %p865_p5 = por %p192_p2, %p191_p0  ;;  %p869_p6 = por %p198_p4, %p197_p3 }
   0xd   : > { %p618_p7 = scmp.ge.s32.totalorder %s778_s29, 1  ;;  %p242_p8 = scmp.lt.s32.totalorder %s778_s29, 3 }
   0xf   : > { %p243_p9 = pnand %p618_p7, %p242_p8 }
  0x10   : > { %p273_p10 = scmp.lt.s32.totalorder (!%p243_p9), %s848_s4, 1  ;;  %s271_s24 = sand.u32 (!%p243_p9), 1, %s770_s27  }
  0x11   : > { %246 = sbr.rel (%p243_p9) target bundleno = 950 (0x3b6), region = 48  ;;  %s627_s9 = sshll.u32 (!%p243_p9), %s848_s4, 4 }
  0x12   : > { %s272_s10 = scalar_lea.vmem (!%p243_p9), [#allocation3], %s271_s24  ;;  %s935_s17 = scalar_lea.hbm (!%p243_p9), %s977_s7, %s627_s9 }
  0x16   : > { %s274_s14 = scalar_select %p273_p10, %s848_s4, 1  ;;  %vm280_vm0 = vcmask 261120   ;;  %v329_v15 = vld [vmem:[%s973_s3 + $0x18] sm:$0xff]  ;;  %v328_v16 = vld [vmem:[%s973_s3 + $0x10] sm:$0xff]  ;;  %v327_v17 = vld [vmem:[%s973_s3 + $0x8] sm:$0xff]  ;;  %v780_v35 = vmov 0  }
  0x17   : > { %642 = vmatprep.subr.mxu0 %v329_v15  ;;  %v326_v18 = vld [vmem:[%s973_s3] sm:$0xff]  ;;  %707 = vset.pattern.permute.xlu1 %v780_v35  ;;  %vm418_vm1 = vcmask 7168   ;;  %vm782_vm2 = vmmov 0   ;;  %vm545_vm3 = vcmask 73728   ;;  %s783_s4 = smov [#allocation3]  }
  0x18   : > { %s630_s15 = sshll.u32 %s274_s14, 4  ;;  %643 = vmatpush3.msra.mxu0 %v329_v15  ;;  %v621_v26 = vld [vmem:[%s971_s1] ss:$0 sm:$0xff]  ;;  %706 = vset.pattern.permute.xlu0 %v780_v35  ;;  %s560_s14 = sshll.u32 %s272_s10, 4  ;;  %s561_s14 = int_to_ptr.vmem [resolvable:$true] %s560_s14 }
  0x19   : > { %s277_s18 = scalar_lea.vmem %s970_s0, %s630_s15  ;;  %644 = vmatprep.subr.mxu0 %v328_v16  ;;  %v622_v28 = vld [vmem:[%s972_s2] ss:$0 sm:$0xff]  ;;  %s718_s19 = scalar_lea.vmem %s561_s14, 16 }
  0x1a   : > { %v278_v1 = vld [vmem:[%s277_s18] sm:$0xff]  ;;  %v279_v2 = vld [vmem:[%s277_s18 + $0x8] sm:$0xff]  ;;  %645 = vmatpush3.msra.mxu0 %v328_v16  ;;  %s548_s18 = scalar_lea.sflag [#allocation4], %s271_s24  ;;  %p719_p11 = scmp.ne.s32.totalorder %s561_s14, %s718_s19 }
  0x1b   : > { %v281_v3 = vsel %vm280_vm0, %v278_v1, 0.0  ;;  %v284_v4 = vsel %vm280_vm0, %v279_v2, 0.0  ;;  %646 = vmatprep.subr.mxu0 %v327_v17  ;;  %v623_v36 = vld [vmem:[#allocation2] ss:$0 sm:$0xff]  ;;  %s722_s20 = sshll.u32 %s783_s4, 4  ;;  %s723_s20 = int_to_ptr.vmem [resolvable:$false] %s722_s20 }
  0x1c   : > { %282 = vadd.xlane.f32.xlu0 %v281_v3  ;;  %647 = vmatpush3.msra.mxu0 %v327_v17  ;;  %p720_p12 = pnand %p719_p11, %p865_p5  ;;  %s724_s21 = scalar_lea.vmem %s723_s20, 32 }
  0x1d   : > { %648 = vmatprep.subr.mxu0 %v326_v18  ;;  %p725_p0 = scmp.lt.s32.totalorder %s561_s14, %s723_s20  ;;  %p726_p1 = scmp.lt.s32.totalorder %s724_s21, %s718_s19 }
  0x1e   : > { %649 = vmatpush3.msra.mxu0 %v326_v18  ;;  %p721_p13 = pneg %p720_p12 }
  0x1f   : > { %p727_p2 = por %p726_p1, %p725_p0 }
  0x20   : > { %285 = vadd.xlane.f32.xlu0 %v284_v4  ;;  %v781_v4 = vmov 0.0  }
  0x21   : > { %653 = vmatprep.subr.mxu1 %v781_v4  ;;  %661 = vmatprep.mubr.msk.f32.mxu1 %vm782_vm2, %v781_v4  ;;  %p728_p3 = pnand %p727_p2, %p721_p13 }
  0xa5   : > { %v283_v5 = vpop.xlane.xlu0 %282 }
  0xa6   : > { %v288_v6 = vmul.f32 0.03125, %v283_v5  ;;  %v470_v5 = vld [vmem:[%s975_s5 + $0x18] sm:$0xff] }
  0xa7   : > { %654 = vmatpush3.msra.mxu1 %v470_v5 }
  0xa8   : > { %v290_v7 = vsub.f32 %v278_v1, %v288_v6  ;;  %655 = vmatprep.subr.mxu1 %v781_v4  ;;  %v469_v6 = vld [vmem:[%s975_s5 + $0x10] sm:$0xff] }
  0xa9   : > { %v286_v8 = vpop.xlane.xlu0 %285  ;;  %656 = vmatpush3.msra.mxu1 %v469_v6 }
  0xaa   : > { %v289_v9 = vmul.f32 0.03125, %v286_v8  ;;  %v292_v10 = vmul.f32 %v290_v7, %v290_v7  ;;  %657 = vmatprep.subr.mxu1 %v781_v4  ;;  %v467_v8 = vld [vmem:[%s975_s5] sm:$0xff] }
  0xac   : > { %v291_v11 = vsub.f32 %v279_v2, %v289_v9  ;;  %v294_v12 = vsel %vm280_vm0, %v292_v10, 0.0 }
  0xad   : > { %295 = vadd.xlane.f32.xlu1 %v294_v12 }
  0xae   : > { %v293_v13 = vmul.f32 %v291_v11, %v291_v11 }
  0xb0   : > { %v297_v14 = vsel %vm280_vm0, %v293_v13, 0.0 }
  0xb1   : > { %298 = vadd.xlane.f32.xlu1 %v297_v14 }
 0x136   : > { %v296_v19 = vpop.xlane.xlu1 %295 }
 0x137   : > { %v300_v20 = vmul.f32 0.03125, %v296_v19 }
 0x139   : > { %v302_v21 = vadd.f32 1e-05, %v300_v20 }
 0x13a   : > { %v299_v22 = vpop.xlane.xlu1 %298 }
 0x13b   : > { %708 = vrsqrt.f32 %v302_v21  ;;  %v301_v23 = vmul.f32 0.03125, %v299_v22  ;;  %v471_v22 = vld [vmem:[%s976_s6] sm:$0x1] }
 0x13d   : > { %v303_v24 = vadd.f32 1e-05, %v301_v23 }
 0x13f   : > { %710 = vrsqrt.f32 %v303_v24 }
 0x148   : > { %v709_v25 = vpop.eup %708 }
 0x149   : > { %v306_v27 = vmul.f32 %v709_v25, %v290_v7  ;;  %v468_v7 = vld [vmem:[%s975_s5 + $0x8] sm:$0xff] }
 0x14a   : > { %658 = vmatpush3.msra.mxu1 %v468_v7 }
 0x14b   : > { %v315_v29 = vmul.f32 %v621_v26, %v306_v27  ;;  %659 = vmatprep.subr.mxu1 %v781_v4 }
 0x14c   : > { %v711_v30 = vpop.eup %710  ;;  %660 = vmatpush3.msra.mxu1 %v467_v8 }
 0x14d   : > { %v307_v31 = vmul.f32 %v711_v30, %v291_v11  ;;  %v902_v32 = vadd.f32 %v622_v28, %v315_v29 }
 0x14f   : > { %v316_v33 = vmul.f32 %v621_v26, %v307_v31  ;;  %650 = vmatprep.mubr.msk.f32.mxu0 %vm280_vm0, %v902_v32 }
 0x151   : > { %v325_v34 = vadd.f32 %v622_v28, %v316_v33 }
 0x153   : > { %651 = vmatmul.mubr.msk.f32.vlgmr.msra.gmra.mxu0 %vm280_vm0, %v325_v34 }
 0x213   : > { %v652_v37 = vpop.f32.mrf.mxu0 }
 0x214   : > { %v415_v38 = vadd.f32 %v652_v37, %v623_v36 }
 0x215   : > { %v409_v39 = vpop.f32.mrf.mxu0 }
 0x216   : > { %v410_v40 = vadd.f32 %v623_v36, %v409_v39  ;;  %v420_v41 = vsel %vm418_vm1, %v415_v38, -inf }
 0x218   : > { %v419_v42 = vsel %vm418_vm1, %v410_v40, -inf }
 0x219   : > { %v421_v43 = vmax.f32 %v419_v42, %v420_v41 }
 0x21b   : > { %v422_v44 = vrot.slane %v421_v43, 4 }
 0x21d   : > { %v423_v45 = vmax.f32 %v421_v43, %v422_v44 }
 0x21f   : > { %v424_v46 = vrot.slane %v423_v45, 2 }
 0x221   : > { %v425_v47 = vmax.f32 %v423_v45, %v424_v46 }
 0x223   : > { %v426_v48 = vrot.slane %v425_v47, 1 }
 0x225   : > { %v427_v49 = vmax.f32 %v425_v47, %v426_v48 }
 0x227   : > { %v428_v50 = vsub.f32 %v410_v40, %v427_v49  ;;  %v429_v51 = vsub.f32 %v415_v38, %v427_v49 }
 0x229   : > { %v430_v52 = vmul.f32 1.442695, %v428_v50  ;;  %v432_v53 = vmul.f32 1.442695, %v429_v51 }
 0x22b   : > { %712 = vpow2.f32 %v430_v52 }
 0x22c   : > { %714 = vpow2.f32 %v432_v53 }
 0x238   : > { %v713_v54 = vpop.eup %712 }
 0x239   : > { %v715_v55 = vpop.eup %714  ;;  %v434_v56 = vsel %vm418_vm1, %v713_v54, 0.0 }
 0x23a   : > { %v435_v57 = vsel %vm418_vm1, %v715_v55, 0.0 }
 0x23b   : > { %v436_v58 = vadd.f32 %v435_v57, %v434_v56 }
 0x23d   : > { %v437_v59 = vrot.slane %v436_v58, 4 }
 0x23f   : > { %v438_v60 = vadd.f32 %v437_v59, %v436_v58 }
 0x241   : > { %v439_v61 = vrot.slane %v438_v60, 2 }
 0x243   : > { %v440_v62 = vadd.f32 %v439_v61, %v438_v60 }
 0x245   : > { %v441_v63 = vrot.slane %v440_v62, 1 }
 0x247   : > { %v442_v0 = vadd.f32 %v441_v63, %v440_v62 }
 0x249   : > { %716 = vrcp.f32 %v442_v0 }
 0x256   : > { %v717_v1 = vpop.eup %716 }
 0x257   : > { %v445_v2 = vmul.f32 %v717_v1, %v715_v55  ;;  %v444_v3 = vmul.f32 %v717_v1, %v713_v54 }
 0x259   : > { %453 = vperm.xlu1 %707, %v445_v2   ;;  %448 = vperm.xlu0 %706, %v444_v3  }
 0x2d4   : > { %v454_v9 = vpop.permute.xlu1 %453  ;;  %v449_v10 = vpop.permute.xlu0 %448 }
 0x2d5   : > { %v457_v11 = vmul.f32 %v454_v9, %v325_v34  ;;  %v456_v12 = vmul.f32 %v449_v10, %v902_v32 }
 0x2d7   : > { %v459_v13 = vsel %vm280_vm0, %v457_v11, 0.0  ;;  %v458_v14 = vsel %vm280_vm0, %v456_v12, 0.0 }
 0x2d8   : > { %v460_v15 = vadd.f32 %v459_v13, %v458_v14 }
 0x2da   : > { %v461_v16 = vrot.slane %v460_v15, 4 }
 0x2dc   : > { %v462_v17 = vadd.f32 %v461_v16, %v460_v15 }
 0x2de   : > { %v463_v18 = vrot.slane %v462_v17, 2 }
 0x2e0   : > { %v464_v19 = vadd.f32 %v463_v18, %v462_v17 }
 0x2e2   : > { %v465_v20 = vrot.slane %v464_v19, 1 }
 0x2e4   : > { %v466_v21 = vadd.f32 %v465_v20, %v464_v19 }
 0x2e6   : > { %662 = vmatmul.mubr.msk.f32.vlgmr.msra.gmra.mxu1 %vm280_vm0, %v466_v21 }
 0x3a6   : > { %v541_v23 = vpop.f32.mrf.mxu1 }
 0x3a7   : > { %v542_v24 = vadd.f32 %v541_v23, %v471_v22 }
 0x3a8   : > { %v663_v25 = vpop.f32.mrf.mxu1 }
 0x3a9   : > { %546 = vst.msk [vmem:[%s272_s10] sm:$0x1] %vm545_vm3, %v542_v24 }
 0x3aa   : > { %731 = shalt.err (!%p728_p3)
}
 0x3ab   : > { %s732_s22 = scalar_lea.hbm %s935_s17, 16  ;;  %s736_s25 = scalar_lea.hbm %s977_s7, 32 }
 0x3ac   : > { %p733_p4 = scmp.ne.s32.totalorder %s935_s17, %s732_s22  ;;  %p737_p9 = scmp.lt.s32.totalorder %s935_s17, %s977_s7 }
 0x3ad   : > { %p738_p10 = scmp.lt.s32.totalorder %s736_s25, %s732_s22 }
 0x3ae   : > { %p734_p7 = pnand %p733_p4, %p865_p5 }
 0x3af   : > { %p739_p11 = por %p738_p10, %p737_p9 }
 0x3b0   : > { %p735_p8 = pneg %p734_p7 }
 0x3b2   : > { %p740_p12 = pnand %p739_p11, %p735_p8 }
 0x3b4   : > { %743 = shalt.err (!%p740_p12)
}
 0x3b5   : > { %664 = dma.vmem_to_hbm [thread:$0]  (%p865_p5), %s561_s14, 16, %s935_s17, %s548_s18  }
 0x3b6 PF: > { %p670_p13 = scmp.ge.s32.totalorder %s778_s29, 2  ;;  %s572_s10 = sand.u32 1, %s766_s26  }
 0x3b7   : > { %s573_s15 = scalar_lea.sflag [#allocation4], %s572_s10 }
 0x3b8   : > { %p667_p0 = pnand %p670_p13, %p869_p6 }
 0x3ba   : > { %p668_p1 = pneg %p667_p0 }
 0x3bc   : > { %761 = dma.done.wait (%p668_p1), %s573_s15, 16  }
 0x3bd   : > { %763 = vsyncadd (%p668_p1), %s573_s15, 4294967280  ;;  %p19_p2 = scmp.ge.s32.totalorder %s852_s8, 4   ;;  %s980_s26 = smov %s770_s27 }
 0x3be   : > { %s981_s27 = smov %s774_s28  ;;  %s982_s28 = smov %s863_s11 }
 0x3bf   : > { %s983_s29 = smov %s852_s8  ;;  %21 = sbr.rel (!%p19_p2) target bundleno = 6 (0x6), region = 83 }
 0x3c4   :  { %577 = vsyncpa [#allocation4], 1 }
 0x3c5   :  { %579 = vsyncpa [#allocation4 + $0x1], 1 }

// kernel: cct_forward.7
= control target key start
LH: loop header
LB: loop body
LE: loop exit
PB: predicated region body
PF: predicated region fallthrough
CT: control target
= control target key end

     0   :  { %s2388_s21 = smov 0   ;;  %s2607_s0 = inlined_call_operand.vmem [shape: f32[2,16,32], index: 0, kind: input, shape index: {}]   ;;  %s2608_s1 = inlined_call_operand.vmem [shape: f32[1,32], index: 1, kind: input, shape index: {}]   ;;  %s2609_s2 = inlined_call_operand.vmem [shape: f32[1,32], index: 2, kind: input, shape index: {}]   ;;  %s2610_s3 = inlined_call_operand.vmem [shape: f32[32,96], index: 3, kind: input, shape index: {}]   ;;  %s2611_s4 = inlined_call_operand.vmem [shape: f32[32,32], index: 4, kind: input, shape index: {}]   ;;  %s2612_s5 = inlined_call_operand.vmem [shape: f32[1,32], index: 5, kind: input, shape index: {}]   ;;  %s2613_s6 = inlined_call_operand.vmem [shape: f32[1,32], index: 6, kind: input, shape index: {}]   ;;  %s2614_s7 = inlined_call_operand.vmem [shape: f32[1,32], index: 7, kind: input, shape index: {}]   ;;  %s2615_s8 = inlined_call_operand.vmem [shape: f32[32,64], index: 8, kind: input, shape index: {}]   ;;  %s2616_s9 = inlined_call_operand.vmem [shape: f32[1,64], index: 9, kind: input, shape index: {}]   ;;  %s2617_s10 = inlined_call_operand.vmem [shape: f32[64,32], index: 10, kind: input, shape index: {}]   ;;  %s2618_s11 = inlined_call_operand.vmem [shape: f32[1,32], index: 11, kind: input, shape index: {}]   ;;  %s2619_s12 = inlined_call_operand.vmem [shape: f32[2,16,32], index: 12, kind: output, shape index: {}]  }
   0x1 LB: > { %s2000_s22 = sadd.s32 4294967295, %s2310_s21   ;;  %p2004_p0 = scmp.ge.s32.totalorder %s2310_s21, 1  ;;  %s2310_s21 = sphi %s2388_s21, %s22_s21  }
   0x2   : > { %p362_p1 = scmp.lt.s32.totalorder %s2310_s21, 3 }
   0x4   : > { %p363_p2 = pnand %p2004_p0, %p362_p1 }
   0x5   : > { %p404_p3 = scmp.lt.s32.totalorder (!%p363_p2), %s2000_s22, 1  ;;  %s2312_s24 = smov (!%p363_p2), 96  }
   0x6   : > { %366 = sbr.rel (%p363_p2) target bundleno = 3217 (0xc91), region = 68  ;;  %s2313_s25 = smov (!%p363_p2), 120  }
   0x7   : > { %s2315_s27 = smov (!%p363_p2), 64   ;;  %s2316_s28 = smov (!%p363_p2), 56  }
   0x8   : > { %s2317_s29 = smov (!%p363_p2), 80   ;;  %s2318_s30 = smov (!%p363_p2), 112  }
   0x9   : > { %s2319_s13 = smov (!%p363_p2), 72   ;;  %s2320_s14 = smov (!%p363_p2), 104  }
   0xa   : > { %s2321_s19 = smov (!%p363_p2), 48   ;;  %s2322_s20 = smov (!%p363_p2), 40  }
   0xb   : > { %s2621_s22 = smov (!%p404_p3, %s2000_s22), 1  ;;  %vm418_vm0 = vcmask 261120   ;;  %v465_v14 = vld [vmem:[%s2610_s3 + $0x18] sm:$0xff]  ;;  %v464_v15 = vld [vmem:[%s2610_s3 + $0x10] sm:$0xff]  ;;  %v463_v16 = vld [vmem:[%s2610_s3 + $0x8] sm:$0xff]  ;;  %vm557_vm1 = vcmask 64512  }
   0xc   : > { %s2056_s23 = sshll.u32 %s2621_s22, 4  ;;  %2124 = vmatprep.subr.mxu0 %v465_v14  ;;  %v462_v17 = vld [vmem:[%s2610_s3] sm:$0xff]  ;;  %vm643_vm2 = vcmask 130048   ;;  %vm1859_vm3 = vcmask 523264  }
   0xd   : > { %s408_s26 = scalar_lea.vmem %s2607_s0, %s2056_s23  ;;  %2125 = vmatpush3.msra.mxu0 %v465_v14  ;;  %v2009_v25 = vld [vmem:[%s2608_s1] ss:$0 sm:$0xff]  ;;  %s413_s16 = scalar_lea.vmem %s2619_s12, %s2056_s23 }
   0xe   : > { %v2404_v0 = vld [vmem:[%s408_s26] sm:$0xff]  ;;  %v2406_v1 = vld [vmem:[%s408_s26 + $0x8] sm:$0xff]  ;;  %2126 = vmatprep.subr.mxu0 %v464_v15  ;;  %s2314_s26 = smov 88  }
   0xf   : > { %v419_v2 = vsel %vm418_vm0, %v2404_v0, 0.0  ;;  %v422_v3 = vsel %vm418_vm0, %v2406_v1, 0.0  ;;  %2127 = vmatpush3.msra.mxu0 %v464_v15  ;;  %v2010_v27 = vld [vmem:[%s2609_s2] ss:$0 sm:$0xff] }
  0x10   : > { %420 = vadd.xlane.f32.xlu0 %v419_v2  ;;  %2128 = vmatprep.subr.mxu0 %v463_v16 }
  0x11   : > { %2129 = vmatpush3.msra.mxu0 %v463_v16 }
  0x12   : > { %2130 = vmatprep.subr.mxu0 %v462_v17 }
  0x13   : > { %2131 = vmatpush3.msra.mxu0 %v462_v17 }
  0x14   : > { %423 = vadd.xlane.f32.xlu0 %v422_v3 }
  0x99   : > { %v421_v4 = vpop.xlane.xlu0 %420 }
  0x9a   : > { %v426_v5 = vmul.f32 0.03125, %v421_v4 }
  0x9c   : > { %v428_v6 = vsub.f32 %v2404_v0, %v426_v5 }
  0x9d   : > { %v424_v7 = vpop.xlane.xlu0 %423 }
  0x9e   : > { %v427_v8 = vmul.f32 0.03125, %v424_v7  ;;  %v430_v9 = vmul.f32 %v428_v6, %v428_v6 }
  0xa0   : > { %v429_v10 = vsub.f32 %v2406_v1, %v427_v8  ;;  %v432_v11 = vsel %vm418_vm0, %v430_v9, 0.0 }
  0xa1   : > { %433 = vadd.xlane.f32.xlu1 %v432_v11 }
  0xa2   : > { %v431_v12 = vmul.f32 %v429_v10, %v429_v10 }
  0xa4   : > { %v435_v13 = vsel %vm418_vm0, %v431_v12, 0.0 }
  0xa5   : > { %436 = vadd.xlane.f32.xlu1 %v435_v13 }
 0x12a   : > { %v434_v18 = vpop.xlane.xlu1 %433 }
 0x12b   : > { %v438_v19 = vmul.f32 0.03125, %v434_v18 }
 0x12d   : > { %v440_v20 = vadd.f32 1e-05, %v438_v19 }
 0x12e   : > { %v437_v21 = vpop.xlane.xlu1 %436 }
 0x12f   : > { %2260 = vrsqrt.f32 %v440_v20  ;;  %v439_v22 = vmul.f32 0.03125, %v437_v21 }
 0x131   : > { %v441_v23 = vadd.f32 1e-05, %v439_v22 }
 0x133   : > { %2262 = vrsqrt.f32 %v441_v23 }
 0x13c   : > { %v2261_v24 = vpop.eup %2260 }
 0x13d   : > { %v444_v26 = vmul.f32 %v2261_v24, %v428_v6 }
 0x13f   : > { %v452_v28 = vmul.f32 %v2009_v25, %v444_v26 }
 0x140   : > { %v2263_v29 = vpop.eup %2262 }
 0x141   : > { %v445_v30 = vmul.f32 %v2263_v29, %v429_v10  ;;  %v460_v31 = vadd.f32 %v2010_v27, %v452_v28  ;;  %v548_v28 = vld [vmem:[%s2611_s4 + $0x8] sm:$0xff]  ;;  %v547_v29 = vld [vmem:[%s2611_s4] sm:$0xff] }
 0x143   : > { %v453_v32 = vmul.f32 %v2009_v25, %v445_v30  ;;  %2132 = vmatprep.mubr.msk.f32.mxu0 %vm418_vm0, %v460_v31 }
 0x145   : > { %v461_v33 = vadd.f32 %v2010_v27, %v453_v32 }
 0x147   : > { %2133 = vmatmul.mubr.msk.f32.vlgmr.msra.gmra.mxu0 %vm418_vm0, %v461_v33 }
 0x207   : > { %v2436_v34 = vpop.f32.mrf.mxu0 }
 0x208   : > { %555 = vrot.lane.b32.xlu0 %v2436_v34, %s2312_s24 }
 0x209   : > { %v2439_v35 = vpop.f32.mrf.mxu0 }
 0x20a   : > { %553 = vrot.lane.b32.xlu1 %v2439_v35, %s2312_s24  ;;  %2139 = vmatprep.mubr.msk.f32.mxu1 %vm557_vm1, %v2439_v35 }
 0x20c   : > { %753 = vrot.lane.b32.xlu0 %v2439_v35, %s2313_s25 }
 0x20e   : > { %759 = vrot.lane.b32.xlu1 %v2436_v34, %s2314_s26 }
 0x212   : > { %757 = vrot.lane.b32.xlu1 %v2439_v35, %s2314_s26 }
 0x216   : > { %755 = vrot.lane.b32.xlu1 %v2436_v34, %s2313_s25 }
 0x27a   : > { %v556_v36 = vpop.permute.xlu0 %555 }
 0x27b   : > { %2135 = vmatprep.subr.msk.mxu1 %vm557_vm1, %v556_v36 }
 0x27c   : > { %2136 = vmatpush3.xpose.msk.msra.mxu1 %vm557_vm1, %v556_v36  ;;  %v554_v37 = vpop.permute.xlu1 %553 }
 0x27d   : > { %2137 = vmatprep.subr.msk.mxu1 %vm557_vm1, %v554_v37 }
 0x27e   : > { %v754_v39 = vpop.permute.xlu0 %753 }
 0x280   : > { %2138 = vmatpush3.xpose.msk.msra.mxu1 %vm557_vm1, %v554_v37  ;;  %v760_v38 = vpop.permute.xlu1 %759 }
 0x281   : > { %2149 = vmatprep.subr.msk.mxu1 %vm557_vm1, %v760_v38 }
 0x283   : > { %2140 = vmatmul.mubr.msk.f32.vlgmr.msra.gmra.mxu1 %vm557_vm1, %v2436_v34 }
 0x284   : > { %v758_v40 = vpop.permute.xlu1 %757  ;;  %2150 = vmatpush3.xpose.msk.msra.mxu1 %vm557_vm1, %v760_v38  ;;  %2153 = vmatprep.mubr.msk.f32.mxu1 %vm557_vm1, %v754_v39 }
 0x285   : > { %2151 = vmatprep.subr.msk.mxu1 %vm557_vm1, %v758_v40 }
 0x288   : > { %2152 = vmatpush3.xpose.msk.msra.mxu1 %vm557_vm1, %v758_v40  ;;  %v756_v41 = vpop.permute.xlu1 %755 }
 0x28b   : > { %2154 = vmatmul.mubr.msk.f32.vlgmr.msra.gmra.mxu1 %vm557_vm1, %v756_v41 }
 0x343   : > { %v2141_v42 = vpop.f32.mrf.mxu1 }
 0x344   : > { %v642_v43 = vmul.f32 0.35355338, %v2141_v42 }
 0x345   : > { %v632_v44 = vpop.f32.mrf.mxu1 }
 0x346   : > { %v641_v45 = vmul.f32 0.35355338, %v632_v44  ;;  %v647_v46 = vsel %vm643_vm2, %v642_v43, -inf }
 0x347   : > { %648 = vmax.xlane.f32.xlu1 %v647_v46 }
 0x348   : > { %v644_v47 = vsel %vm643_vm2, %v641_v45, -inf }
 0x349   : > { %645 = vmax.xlane.f32.xlu0 %v644_v47 }
 0x34b   : > { %v2155_v48 = vpop.f32.mrf.mxu1 }
 0x34c   : > { %v845_v51 = vmul.f32 0.35355338, %v2155_v48 }
 0x34d   : > { %v835_v49 = vpop.f32.mrf.mxu1 }
 0x34e   : > { %v844_v50 = vmul.f32 0.35355338, %v835_v49  ;;  %v849_v53 = vsel %vm643_vm2, %v845_v51, -inf }
 0x350   : > { %v846_v52 = vsel %vm643_vm2, %v844_v50, -inf }
 0x351   : > { %847 = vmax.xlane.f32.xlu0 %v846_v52 }
 0x355   : > { %850 = vmax.xlane.f32.xlu0 %v849_v53 }
 0x3d0   : > { %v649_v54 = vpop.xlane.xlu1 %648 }
 0x3d1   : > { %v651_v55 = vsub.f32 %v642_v43, %v649_v54 }
 0x3d2   : > { %v646_v56 = vpop.xlane.xlu0 %645 }
 0x3d3   : > { %v654_v57 = vmul.f32 1.442695, %v651_v55  ;;  %v650_v58 = vsub.f32 %v641_v45, %v646_v56 }
 0x3d5   : > { %2264 = vpow2.f32 %v654_v57  ;;  %v652_v59 = vmul.f32 1.442695, %v650_v58 }
 0x3d7   : > { %2266 = vpow2.f32 %v652_v59 }
 0x3da   : > { %v848_v60 = vpop.xlane.xlu0 %847 }
 0x3db   : > { %v852_v61 = vsub.f32 %v844_v50, %v848_v60 }
 0x3dd   : > { %v854_v62 = vmul.f32 1.442695, %v852_v61 }
 0x3de   : > { %v851_v63 = vpop.xlane.xlu0 %850 }
 0x3df   : > { %2268 = vpow2.f32 %v854_v62  ;;  %v853_v2 = vsub.f32 %v845_v51, %v851_v63 }
 0x3e1   : > { %v856_v3 = vmul.f32 1.442695, %v853_v2 }
 0x3e2   : > { %v2265_v4 = vpop.eup %2264 }
 0x3e3   : > { %2270 = vpow2.f32 %v856_v3  ;;  %v659_v5 = vsel %vm643_vm2, %v2265_v4, 0.0 }
 0x3e4   : > { %v2267_v6 = vpop.eup %2266  ;;  %660 = vadd.xlane.f32.xlu1 %v659_v5 }
 0x3e5   : > { %v656_v7 = vsel %vm643_vm2, %v2267_v6, 0.0 }
 0x3e6   : > { %657 = vadd.xlane.f32.xlu0 %v656_v7 }
 0x3ec   : > { %v2269_v8 = vpop.eup %2268 }
 0x3ed   : > { %v858_v9 = vsel %vm643_vm2, %v2269_v8, 0.0 }
 0x3ee   : > { %859 = vadd.xlane.f32.xlu0 %v858_v9 }
 0x3f0   : > { %v2271_v10 = vpop.eup %2270 }
 0x3f1   : > { %v861_v11 = vsel %vm643_vm2, %v2271_v10, 0.0 }
 0x3f2   : > { %862 = vadd.xlane.f32.xlu1 %v861_v11 }
 0x403   : > { %666 = vrot.lane.b32.xlu1 %v2439_v35, %s2315_s27 }
 0x404   : > { %668 = vrot.lane.b32.xlu0 %v2436_v34, %s2315_s27 }
 0x407   : > { %870 = vrot.lane.b32.xlu1 %v2436_v34, %s2316_s28 }
 0x408   : > { %1123 = vrot.lane.b32.xlu0 %v2436_v34, %s2317_s29 }
 0x40b   : > { %868 = vrot.lane.b32.xlu1 %v2439_v35, %s2316_s28 }
 0x40c   : > { %1117 = vrot.lane.b32.xlu0 %v2439_v35, %s2318_s30 }
 0x40f   : > { %1121 = vrot.lane.b32.xlu1 %v2439_v35, %s2317_s29 }
 0x410   : > { %1408 = vrot.lane.b32.xlu0 %v2436_v34, %s2319_s13 }
 0x413   : > { %1119 = vrot.lane.b32.xlu1 %v2436_v34, %s2318_s30 }
 0x414   : > { %1402 = vrot.lane.b32.xlu0 %v2439_v35, %s2320_s14 }
 0x417   : > { %1406 = vrot.lane.b32.xlu1 %v2439_v35, %s2319_s13 }
 0x41b   : > { %1404 = vrot.lane.b32.xlu1 %v2436_v34, %s2320_s14 }
 0x46d   : > { %v661_v12 = vpop.xlane.xlu1 %660 }
 0x46e   : > { %2272 = vrcp.f32 %v661_v12 }
 0x46f   : > { %v658_v13 = vpop.xlane.xlu0 %657 }
 0x470   : > { %2274 = vrcp.f32 %v658_v13 }
 0x477   : > { %v860_v14 = vpop.xlane.xlu0 %859 }
 0x478   : > { %2276 = vrcp.f32 %v860_v14 }
 0x47b   : > { %v863_v15 = vpop.xlane.xlu1 %862  ;;  %v669_v16 = vpop.permute.xlu0 %668 }
 0x47c   : > { %v2273_v17 = vpop.eup %2272  ;;  %2278 = vrcp.f32 %v863_v15  ;;  %2142 = vmatprep.subr.mxu0 %v669_v16 }
 0x47d   : > { %v2275_v18 = vpop.eup %2274  ;;  %2143 = vmatpush3.msra.mxu0 %v669_v16  ;;  %v665_v21 = vmul.f32 %v2273_v17, %v2265_v4 }
 0x47e   : > { %v664_v19 = vmul.f32 %v2275_v18, %v2267_v6 }
 0x47f   : > { %v667_v20 = vpop.permute.xlu1 %666  ;;  %v1124_v31 = vpop.permute.xlu0 %1123 }
 0x480   : > { %2144 = vmatprep.subr.mxu0 %v667_v20  ;;  %2146 = vmatprep.mubr.msk.f32.mxu0 %vm643_vm2, %v664_v19  ;;  %v549_v19 = vld [vmem:[%s2611_s4 + $0x10] sm:$0xff] }
 0x481   : > { %2145 = vmatpush3.msra.mxu0 %v667_v20 }
 0x482   : > { %2147 = vmatmul.mubr.msk.f32.vlgmr.msra.gmra.mxu0 %vm643_vm2, %v665_v21 }
 0x483   : > { %v871_v22 = vpop.permute.xlu1 %870  ;;  %v1118_v37 = vpop.permute.xlu0 %1117 }
 0x484   : > { %2156 = vmatprep.subr.mxu0 %v871_v22 }
 0x485   : > { %v2277_v23 = vpop.eup %2276  ;;  %2157 = vmatpush3.msra.mxu0 %v871_v22 }
 0x486   : > { %v866_v24 = vmul.f32 %v2277_v23, %v2269_v8 }
 0x487   : > { %v869_v25 = vpop.permute.xlu1 %868  ;;  %v1409_v39 = vpop.permute.xlu0 %1408 }
 0x488   : > { %2158 = vmatprep.subr.mxu0 %v869_v25  ;;  %2160 = vmatprep.mubr.msk.f32.mxu0 %vm643_vm2, %v866_v24 }
 0x489   : > { %v2279_v26 = vpop.eup %2278  ;;  %2159 = vmatpush3.msra.mxu0 %v869_v25 }
 0x48a   : > { %v867_v27 = vmul.f32 %v2279_v26, %v2271_v10  ;;  %2163 = vmatprep.subr.mxu0 %v548_v28 }
 0x48b   : > { %v1122_v38 = vpop.permute.xlu1 %1121  ;;  %v1403_v41 = vpop.permute.xlu0 %1402 }
 0x48c   : > { %2161 = vmatmul.mubr.msk.f32.vlgmr.msra.gmra.mxu0 %vm643_vm2, %v867_v27 }
 0x48d   : > { %2164 = vmatpush3.msra.mxu0 %v548_v28 }
 0x48e   : > { %2168 = vmatprep.subr.mxu0 %v547_v29 }
 0x48f   : > { %v1120_v40 = vpop.permute.xlu1 %1119 }
 0x493   : > { %v1407_v42 = vpop.permute.xlu1 %1406 }
 0x497   : > { %v1405_v43 = vpop.permute.xlu1 %1404 }
 0x542   : > { %v2148_v30 = vpop.f32.mrf.mxu0 }
 0x544   : > { %v744_v32 = vpop.f32.mrf.mxu0 }
 0x54c   : > { %v2162_v33 = vpop.f32.mrf.mxu0 }
 0x54e   : > { %v946_v36 = vpop.f32.mrf.mxu0 }
 0x54f   : > { %2165 = vmatprep.mubr.msk.f32.mxu0 %vm557_vm1, %v946_v36 }
 0x550   : > { %2166 = vmatmul.mubr.msk.f32.vlgmr.msra.gmra.mxu0 %vm557_vm1, %v2162_v33 }
 0x551   : > { %2169 = vmatpush3.msra.mxu0 %v547_v29  ;;  %2170 = vmatprep.mubr.msk.f32.mxu0 %vm557_vm1, %v744_v32 }
 0x552   : > { %2173 = vmatprep.subr.msk.mxu0 %vm557_vm1, %v1124_v31 }
 0x554   : > { %2171 = vmatmul.mubr.msk.f32.vlgmr.msra.gmra.mxu0 %vm557_vm1, %v2148_v30 }
 0x555   : > { %2174 = vmatpush3.xpose.msk.msra.mxu0 %vm557_vm1, %v1124_v31  ;;  %2177 = vmatprep.mubr.msk.f32.mxu0 %vm557_vm1, %v1118_v37 }
 0x556   : > { %2175 = vmatprep.subr.msk.mxu0 %vm557_vm1, %v1122_v38 }
 0x559   : > { %2176 = vmatpush3.xpose.msk.msra.mxu0 %vm557_vm1, %v1122_v38 }
 0x55a   : > { %2192 = vmatprep.subr.msk.mxu0 %vm557_vm1, %v1409_v39 }
 0x55c   : > { %2178 = vmatmul.mubr.msk.f32.vlgmr.msra.gmra.mxu0 %vm557_vm1, %v1120_v40 }
 0x55d   : > { %2193 = vmatpush3.xpose.msk.msra.mxu0 %vm557_vm1, %v1409_v39  ;;  %2196 = vmatprep.mubr.msk.f32.mxu0 %vm557_vm1, %v1403_v41 }
 0x55e   : > { %2194 = vmatprep.subr.msk.mxu0 %vm557_vm1, %v1407_v42 }
 0x561   : > { %2195 = vmatpush3.xpose.msk.msra.mxu0 %vm557_vm1, %v1407_v42 }
 0x564   : > { %2197 = vmatmul.mubr.msk.f32.vlgmr.msra.gmra.mxu0 %vm557_vm1, %v1405_v43 }
 0x610   : > { %v2167_v44 = vpop.f32.mrf.mxu0 }
 0x612   : > { %v1027_v45 = vpop.f32.mrf.mxu0 }
 0x614   : > { %v2172_v46 = vpop.f32.mrf.mxu0 }
 0x615   : > { %v2506_v47 = vadd.f32 %v2172_v46, %v2167_v44 }
 0x616   : > { %v1108_v48 = vpop.f32.mrf.mxu0 }
 0x617   : > { %v2508_v49 = vadd.f32 %v1108_v48, %v1027_v45 }
 0x61c   : > { %v2179_v50 = vpop.f32.mrf.mxu0 }
 0x61d   : > { %v1209_v51 = vmul.f32 0.35355338, %v2179_v50 }
 0x61e   : > { %v1199_v52 = vpop.f32.mrf.mxu0 }
 0x61f   : > { %v1208_v53 = vmul.f32 0.35355338, %v1199_v52  ;;  %v1213_v54 = vsel %vm643_vm2, %v1209_v51, -inf }
 0x620   : > { %1214 = vmax.xlane.f32.xlu1 %v1213_v54 }
 0x621   : > { %v1210_v55 = vsel %vm643_vm2, %v1208_v53, -inf }
 0x622   : > { %1211 = vmax.xlane.f32.xlu0 %v1210_v55 }
 0x624   : > { %v2198_v56 = vpop.f32.mrf.mxu0 }
 0x625   : > { %v1494_v12 = vmul.f32 0.35355338, %v2198_v56 }
 0x626   : > { %v1484_v57 = vpop.f32.mrf.mxu0 }
 0x627   : > { %v1493_v58 = vmul.f32 0.35355338, %v1484_v57  ;;  %v1498_v13 = vsel %vm643_vm2, %v1494_v12, -inf }
 0x629   : > { %v1495_v59 = vsel %vm643_vm2, %v1493_v58, -inf }
 0x631   : > { %1232 = vrot.lane.b32.xlu1 %v2439_v35, %s2321_s19 }
 0x655   : > { %1496 = vmax.xlane.f32.xlu1 %v1495_v59 }
 0x6a9   : > { %v1215_v60 = vpop.xlane.xlu1 %1214 }
 0x6aa   : > { %v1217_v61 = vsub.f32 %v1209_v51, %v1215_v60  ;;  %v2045_v51 = vld [vmem:[%s2612_s5] ss:$0 sm:$0xff] }
 0x6ab   : > { %v1212_v62 = vpop.xlane.xlu0 %1211 }
 0x6ac   : > { %v1220_v63 = vmul.f32 1.442695, %v1217_v61  ;;  %v1216_v2 = vsub.f32 %v1208_v53, %v1212_v62 }
 0x6ad   : > { %v1233_v8 = vpop.permute.xlu1 %1232 }
 0x6ae   : > { %2280 = vpow2.f32 %v1220_v63  ;;  %v1218_v3 = vmul.f32 1.442695, %v1216_v2 }
 0x6b0   : > { %2282 = vpow2.f32 %v1218_v3  ;;  %v1745_v3 = vld [vmem:[%s2615_s8 + $0x18] sm:$0xff] }
 0x6b1   : > { %2211 = vmatprep.subr.mxu0 %v1745_v3 }
 0x6b2   : > { %2212 = vmatpush3.msra.mxu0 %v1745_v3 }
 0x6bb   : > { %v2281_v4 = vpop.eup %2280 }
 0x6bc   : > { %v1225_v5 = vsel %vm643_vm2, %v2281_v4, 0.0 }
 0x6bd   : > { %v2283_v6 = vpop.eup %2282  ;;  %1226 = vadd.xlane.f32.xlu0 %v1225_v5  ;;  %v1743_v5 = vld [vmem:[%s2615_s8 + $0x8] sm:$0xff] }
 0x6be   : > { %v1222_v7 = vsel %vm643_vm2, %v2283_v6, 0.0 }
 0x6c1   : > { %1223 = vadd.xlane.f32.xlu0 %v1222_v7 }
 0x6d7   : > { %1234 = vrot.lane.b32.xlu0 %v2436_v34, %s2321_s19 }
 0x6de   : > { %v1497_v9 = vpop.xlane.xlu1 %1496 }
 0x6df   : > { %v1501_v10 = vsub.f32 %v1493_v58, %v1497_v9 }
 0x6e1   : > { %v1503_v11 = vmul.f32 1.442695, %v1501_v10 }
 0x6e3   : > { %2284 = vpow2.f32 %v1503_v11 }
 0x6f0   : > { %v2285_v14 = vpop.eup %2284 }
 0x6f1   : > { %v1507_v15 = vsel %vm643_vm2, %v2285_v14, 0.0 }
 0x6f6   : > { %1499 = vmax.xlane.f32.xlu0 %v1498_v13 }
 0x6fa   : > { %1508 = vadd.xlane.f32.xlu0 %v1507_v15 }
 0x710   : > { %1519 = vrot.lane.b32.xlu0 %v2436_v34, %s2322_s20 }
 0x746   : > { %v1227_v16 = vpop.xlane.xlu0 %1226 }
 0x747   : > { %2286 = vrcp.f32 %v1227_v16 }
 0x74a   : > { %v1224_v17 = vpop.xlane.xlu0 %1223 }
 0x74b   : > { %2288 = vrcp.f32 %v1224_v17 }
 0x74e   : > { %v1235_v18 = vpop.permute.xlu0 %1234 }
 0x74f   : > { %2180 = vmatprep.subr.mxu1 %v1235_v18 }
 0x750   : > { %2181 = vmatpush3.msra.mxu1 %v1235_v18 }
 0x751   : > { %2182 = vmatprep.subr.mxu1 %v1233_v8 }
 0x752   : > { %2183 = vmatpush3.msra.mxu1 %v1233_v8 }
 0x753   : > { %2187 = vmatprep.subr.mxu1 %v549_v19 }
 0x754   : > { %v2287_v20 = vpop.eup %2286 }
 0x755   : > { %v1231_v23 = vmul.f32 %v2287_v20, %v2281_v4  ;;  %v1744_v4 = vld [vmem:[%s2615_s8 + $0x10] sm:$0xff] }
 0x756   : > { %2213 = vmatprep.subr.mxu0 %v1744_v4 }
 0x757   : > { %2214 = vmatpush3.msra.mxu0 %v1744_v4 }
 0x758   : > { %v2289_v21 = vpop.eup %2288  ;;  %2215 = vmatprep.subr.mxu0 %v1743_v5 }
 0x759   : > { %v1230_v22 = vmul.f32 %v2289_v21, %v2283_v6  ;;  %v1742_v6 = vld [vmem:[%s2615_s8] sm:$0xff]  ;;  %2216 = vmatpush3.msra.mxu0 %v1743_v5 }
 0x75a   : > { %2217 = vmatprep.subr.mxu0 %v1742_v6 }
 0x75b   : > { %2184 = vmatprep.mubr.msk.f32.mxu1 %vm643_vm2, %v1230_v22  ;;  %2218 = vmatpush3.msra.mxu0 %v1742_v6 }
 0x75c   : > { %2185 = vmatmul.mubr.msk.f32.vlgmr.msra.gmra.mxu1 %vm643_vm2, %v1231_v23  ;;  %v1851_v23 = vld [vmem:[%s2617_s10 + $0x38] sm:$0xff] }
 0x75d   : > { %2188 = vmatpush3.msra.mxu1 %v549_v19  ;;  %v2047_v19 = vld [vmem:[%s2614_s7] ss:$0 sm:$0xff] }
 0x77f   : > { %v1500_v34 = vpop.xlane.xlu0 %1499 }
 0x780   : > { %v1502_v24 = vsub.f32 %v1494_v12, %v1500_v34  ;;  %v1850_v34 = vld [vmem:[%s2617_s10 + $0x30] sm:$0xff] }
 0x782   : > { %v1505_v25 = vmul.f32 1.442695, %v1502_v24  ;;  %v1849_v24 = vld [vmem:[%s2617_s10 + $0x28] sm:$0xff] }
 0x783   : > { %v1509_v26 = vpop.xlane.xlu0 %1508 }
 0x784   : > { %2290 = vpow2.f32 %v1505_v25  ;;  %v1848_v25 = vld [vmem:[%s2617_s10 + $0x20] sm:$0xff] }
 0x785   : > { %2292 = vrcp.f32 %v1509_v26  ;;  %v1847_v26 = vld [vmem:[%s2617_s10 + $0x18] sm:$0xff] }
 0x787   : > { %v1520_v27 = vpop.permute.xlu0 %1519 }
 0x788   : > { %2199 = vmatprep.subr.mxu1 %v1520_v27 }
 0x791   : > { %v2291_v28 = vpop.eup %2290 }
 0x792   : > { %v1510_v29 = vsel %vm643_vm2, %v2291_v28, 0.0  ;;  %v2293_v30 = vpop.eup %2292 }
 0x793   : > { %1511 = vadd.xlane.f32.xlu1 %v1510_v29  ;;  %v1515_v36 = vmul.f32 %v2293_v30, %v2285_v14  ;;  %v2046_v14 = vld [vmem:[%s2613_s6] ss:$0 sm:$0xff] }
 0x794   : > { %v1844_v29 = vld [vmem:[%s2617_s10] sm:$0xff] }
 0x795   : > { %v2048_v30 = vld [vmem:[%s2616_s9] ss:$0 sm:$0xff] }
 0x7a4   : > { %1517 = vrot.lane.b32.xlu1 %v2439_v35, %s2322_s20  ;;  %v550_v35 = vld [vmem:[%s2611_s4 + $0x18] sm:$0xff] }
 0x81c   : > { %v2186_v31 = vpop.f32.mrf.mxu1  ;;  %v1512_v32 = vpop.xlane.xlu1 %1511 }
 0x81d   : > { %2294 = vrcp.f32 %v1512_v32 }
 0x81e   : > { %v1310_v33 = vpop.f32.mrf.mxu1 }
 0x81f   : > { %2189 = vmatprep.mubr.msk.f32.mxu1 %vm557_vm1, %v1310_v33 }
 0x820   : > { %2190 = vmatmul.mubr.msk.f32.vlgmr.msra.gmra.mxu1 %vm557_vm1, %v2186_v31  ;;  %v1518_v37 = vpop.permute.xlu1 %1517 }
 0x821   : > { %2200 = vmatpush3.msra.mxu1 %v1520_v27  ;;  %2203 = vmatprep.mubr.msk.f32.mxu1 %vm643_vm2, %v1515_v36  ;;  %v1846_v27 = vld [vmem:[%s2617_s10 + $0x10] sm:$0xff] }
 0x822   : > { %2201 = vmatprep.subr.mxu1 %v1518_v37 }
 0x823   : > { %2202 = vmatpush3.msra.mxu1 %v1518_v37 }
 0x824   : > { %2206 = vmatprep.subr.mxu1 %v550_v35 }
 0x82a   : > { %v2295_v38 = vpop.eup %2294 }
 0x82b   : > { %v1516_v39 = vmul.f32 %v2295_v38, %v2291_v28  ;;  %v1845_v28 = vld [vmem:[%s2617_s10 + $0x8] sm:$0xff] }
 0x82d   : > { %2204 = vmatmul.mubr.msk.f32.vlgmr.msra.gmra.mxu1 %vm643_vm2, %v1516_v39 }
 0x82e   : > { %2207 = vmatpush3.msra.mxu1 %v550_v35 }
 0x82f   : > { %2222 = vmatprep.subr.mxu1 %v1851_v23 }
 0x8e0   : > { %v2191_v40 = vpop.f32.mrf.mxu1 }
 0x8e1   : > { %v1401_v41 = vadd.f32 %v2191_v40, %v2506_v47 }
 0x8e2   : > { %v1391_v42 = vpop.f32.mrf.mxu1 }
 0x8e3   : > { %v1400_v43 = vadd.f32 %v1391_v42, %v2508_v49 }
 0x8ed   : > { %v2205_v44 = vpop.f32.mrf.mxu1 }
 0x8ef   : > { %v1595_v45 = vpop.f32.mrf.mxu1 }
 0x8f0   : > { %2208 = vmatprep.mubr.msk.f32.mxu1 %vm557_vm1, %v1595_v45 }
 0x8f1   : > { %2209 = vmatmul.mubr.msk.f32.vlgmr.msra.gmra.mxu1 %vm557_vm1, %v2205_v44 }
 0x8f2   : > { %2223 = vmatpush3.msra.mxu1 %v1851_v23 }
 0x8f3   : > { %2224 = vmatprep.subr.mxu1 %v1850_v34 }
 0x8f4   : > { %2225 = vmatpush3.msra.mxu1 %v1850_v34 }
 0x8f5   : > { %2226 = vmatprep.subr.mxu1 %v1849_v24 }
 0x8f6   : > { %2227 = vmatpush3.msra.mxu1 %v1849_v24 }
 0x8f7   : > { %2228 = vmatprep.subr.mxu1 %v1848_v25 }
 0x8f8   : > { %2229 = vmatpush3.msra.mxu1 %v1848_v25 }
 0x8f9   : > { %2230 = vmatprep.subr.mxu1 %v1847_v26 }
 0x8fa   : > { %2231 = vmatpush3.msra.mxu1 %v1847_v26 }
 0x8fb   : > { %2232 = vmatprep.subr.mxu1 %v1846_v27 }
 0x8fc   : > { %2233 = vmatpush3.msra.mxu1 %v1846_v27 }
 0x8fd   : > { %2234 = vmatprep.subr.mxu1 %v1845_v28 }
 0x8fe   : > { %2235 = vmatpush3.msra.mxu1 %v1845_v28 }
 0x8ff   : > { %2236 = vmatprep.subr.mxu1 %v1844_v29 }
 0x900   : > { %2237 = vmatpush3.msra.mxu1 %v1844_v29 }
 0x9b1   : > { %v2210_v46 = vpop.f32.mrf.mxu1 }
 0x9b2   : > { %v1686_v48 = vadd.f32 %v2210_v46, %v1401_v41  ;;  %v2051_v46 = vld [vmem:[%s2618_s11] ss:$0 sm:$0xff] }
 0x9b3   : > { %v1676_v50 = vpop.f32.mrf.mxu1 }
 0x9b4   : > { %v1688_v52 = vadd.f32 %v1686_v48, %v2406_v1  ;;  %v1685_v53 = vadd.f32 %v1676_v50, %v1400_v43 }
 0x9b6   : > { %v1687_v47 = vadd.f32 %v1685_v53, %v2404_v0  ;;  %v1697_v54 = vadd.f32 %v2045_v51, %v1688_v52 }
 0x9b8   : > { %v1703_v49 = vsel %vm418_vm0, %v1697_v54, 0.0  ;;  %v1696_v55 = vadd.f32 %v2045_v51, %v1687_v47 }
 0x9b9   : > { %1704 = vadd.xlane.f32.xlu0 %v1703_v49 }
 0x9ba   : > { %v1700_v56 = vsel %vm418_vm0, %v1696_v55, 0.0 }
 0x9bb   : > { %1701 = vadd.xlane.f32.xlu1 %v1700_v56 }
 0xa42   : > { %v1705_v57 = vpop.xlane.xlu0 %1704 }
 0xa43   : > { %v1707_v58 = vmul.f32 0.03125, %v1705_v57 }
 0xa44   : > { %v1702_v59 = vpop.xlane.xlu1 %1701 }
 0xa45   : > { %v1709_v60 = vsub.f32 %v1697_v54, %v1707_v58  ;;  %v1706_v61 = vmul.f32 0.03125, %v1702_v59 }
 0xa47   : > { %v1708_v62 = vsub.f32 %v1696_v55, %v1706_v61  ;;  %v1711_v63 = vmul.f32 %v1709_v60, %v1709_v60 }
 0xa49   : > { %v1715_v1 = vsel %vm418_vm0, %v1711_v63, 0.0  ;;  %v1710_v2 = vmul.f32 %v1708_v62, %v1708_v62 }
 0xa4a   : > { %1716 = vadd.xlane.f32.xlu1 %v1715_v1 }
 0xa4b   : > { %v1712_v0 = vsel %vm418_vm0, %v1710_v2, 0.0 }
 0xa4c   : > { %1713 = vadd.xlane.f32.xlu0 %v1712_v0 }
 0xad3   : > { %v1717_v7 = vpop.xlane.xlu1 %1716 }
 0xad4   : > { %v1719_v8 = vmul.f32 0.03125, %v1717_v7 }
 0xad5   : > { %v1714_v9 = vpop.xlane.xlu0 %1713 }
 0xad6   : > { %v1721_v10 = vadd.f32 1e-05, %v1719_v8  ;;  %v1718_v11 = vmul.f32 0.03125, %v1714_v9 }
 0xad8   : > { %2296 = vrsqrt.f32 %v1721_v10  ;;  %v1720_v12 = vadd.f32 1e-05, %v1718_v11 }
 0xada   : > { %2298 = vrsqrt.f32 %v1720_v12 }
 0xae5   : > { %v2297_v13 = vpop.eup %2296 }
 0xae6   : > { %v1725_v15 = vmul.f32 %v2297_v13, %v1709_v60 }
 0xae7   : > { %v2299_v16 = vpop.eup %2298 }
 0xae8   : > { %v1724_v17 = vmul.f32 %v2299_v16, %v1708_v62  ;;  %v1733_v18 = vmul.f32 %v2046_v14, %v1725_v15 }
 0xaea   : > { %v1732_v20 = vmul.f32 %v2046_v14, %v1724_v17  ;;  %v1741_v22 = vadd.f32 %v2047_v19, %v1733_v18 }
 0xaec   : > { %v1740_v21 = vadd.f32 %v2047_v19, %v1732_v20 }
 0xaee   : > { %2219 = vmatprep.mubr.msk.f32.mxu0 %vm418_vm0, %v1740_v21 }
 0xaef   : > { %2220 = vmatmul.mubr.msk.f32.vlgmr.msra.gmra.mxu0 %vm418_vm0, %v1741_v22 }
 0xbaf   : > { %v2221_v31 = vpop.f32.mrf.mxu0 }
 0xbb0   : > { %v1831_v32 = vadd.f32 %v2221_v31, %v2048_v30 }
 0xbb1   : > { %v1825_v33 = vpop.f32.mrf.mxu0 }
 0xbb2   : > { %v1837_v36 = vmul.f32 0.70710677, %v1831_v32  ;;  %v1826_v37 = vadd.f32 %v2048_v30, %v1825_v33  ;;  %v1835_v43 = vmul.f32 0.5, %v1831_v32 }
 0xbb4   : > { %2300 = verf.f32 %v1837_v36  ;;  %v1836_v38 = vmul.f32 0.70710677, %v1826_v37  ;;  %v1834_v41 = vmul.f32 0.5, %v1826_v37 }
 0xbb6   : > { %2302 = verf.f32 %v1836_v38 }
 0xbc1   : > { %v2301_v39 = vpop.eup %2300 }
 0xbc2   : > { %v1841_v40 = vadd.f32 1.0, %v2301_v39 }
 0xbc3   : > { %v2303_v35 = vpop.eup %2302 }
 0xbc4   : > { %v1840_v42 = vadd.f32 1.0, %v2303_v35  ;;  %v1843_v45 = vmul.f32 %v1841_v40, %v1835_v43 }
 0xbc6   : > { %v1842_v44 = vmul.f32 %v1840_v42, %v1834_v41 }
 0xbc8   : > { %2238 = vmatprep.mubr.msk.f32.mxu1 %vm1859_vm3, %v1842_v44 }
 0xbc9   : > { %2239 = vmatmul.mubr.msk.f32.vlgmr.msra.gmra.mxu1 %vm1859_vm3, %v1843_v45 }
 0xc89   : > { %v2240_v48 = vpop.f32.mrf.mxu1 }
 0xc8a   : > { %v1938_v50 = vadd.f32 %v2240_v48, %v2051_v46 }
 0xc8b   : > { %v1932_v51 = vpop.f32.mrf.mxu1 }
 0xc8c   : > { %v1942_v52 = vadd.f32 %v1938_v50, %v1741_v22  ;;  %v1933_v53 = vadd.f32 %v2051_v46, %v1932_v51 }
 0xc8e   : > { %1944 = vst.msk [vmem:[%s413_s16 + $0x8] sm:$0xff] %vm418_vm0, %v1942_v52  ;;  %v1941_v47 = vadd.f32 %v1933_v53, %v1740_v21 }
 0xc90   : > { %1943 = vst.msk [vmem:[%s413_s16] sm:$0xff] %vm418_vm0, %v1941_v47 }
 0xc91 PF: > { %s22_s21 = sadd.s32 1, %s2310_s21  }
 0xc92   : > { %p19_p4 = scmp.ge.s32.totalorder %s22_s21, 4  }
 0xc94   :  { %21 = sbr.rel (!%p19_p4) target bundleno = 1 (0x1), region = 98 }

</bundles_post_ra>
